<compile_context>
chip_gen: v7x
topology: tpu7x:2x2x1
jax: 0.10.0
libtpu: 0.0.40
codegen_flags: <defaults>
</compile_context>

<pallas_src>
import functools
import math

import jax
import jax.numpy as jnp
from jax.experimental import pallas as pl
from jax.experimental.pallas import tpu as pltpu


# ----------------------------------------------------------------------------
# Kernel 1: fused attention branch (one batch per grid step)
# ----------------------------------------------------------------------------

def _fused_attn_block_kernel(gate_ref, x_ref, objs_ref, linw_ref, linb_ref,
                             n1g_ref, n1b_ref, wqkv_ref, wo_ref, bo_ref,
                             o_ref, *, n_heads, d_head):
    """out = x + tanh(alpha_attn) * CrossAttn(LN1(cat[x, Linear(objs)]))[:Nv]."""
    Nv = x_ref.shape[1]
    inner = n_heads * d_head
    mm_dtype = x_ref.dtype            # feed MXU in native dtype (bf16 stays bf16), accumulate f32

    x = x_ref[0].astype(jnp.float32)                      # (Nv, D)
    objs = objs_ref[0]                                    # (No, Dctx)

    # objs = self.linear(objs)
    objs_p = (jnp.dot(objs.astype(mm_dtype), linw_ref[...],
                      preferred_element_type=jnp.float32) + linb_ref[...])

    # LayerNorm1 (row-wise, f32 statistics, eps=1e-5 like torch)
    def _ln1(t):
        mu = jnp.mean(t, axis=-1, keepdims=True)
        var = jnp.mean((t - mu) ** 2, axis=-1, keepdims=True)
        return (t - mu) * jax.lax.rsqrt(var + 1e-5) * n1g_ref[...] + n1b_ref[...]

    h = jnp.concatenate([_ln1(x), _ln1(objs_p)], axis=0)  # (N, D)

    # Fused QKV projection (softmax scale is pre-folded into the q columns of wqkv).
    qkv = jnp.dot(h.astype(mm_dtype), wqkv_ref[...], preferred_element_type=jnp.float32)
    q = qkv[:Nv, 0 * inner:1 * inner]   # only the visual-token queries are ever used
    k = qkv[:, 1 * inner:2 * inner]
    v = qkv[:, 2 * inner:3 * inner]

    # Per-head attention with static lane slices; out-projection folded in per head so the
    # lane-sparse (Nv, d_head) tensors never leave vregs.
    acc = None
    for hh in range(n_heads):
        sl = slice(hh * d_head, (hh + 1) * d_head)
        qh, kh, vh = q[:, sl], k[:, sl], v[:, sl]
        sim = jax.lax.dot_general(qh.astype(mm_dtype), kh.astype(mm_dtype),
                                  (((1,), (1,)), ((), ())),
                                  preferred_element_type=jnp.float32)      # (Nv, N)
        sim = sim - jnp.max(sim, axis=-1, keepdims=True)
        p = jnp.exp(sim)
        attn = p * pl.reciprocal(jnp.sum(p, axis=-1, keepdims=True), approx=True)
        oh = jnp.dot(attn.astype(mm_dtype), vh.astype(mm_dtype),
                     preferred_element_type=jnp.float32)                   # (Nv, d)
        contrib = jnp.dot(oh.astype(mm_dtype), wo_ref[sl, :],
                          preferred_element_type=jnp.float32)              # (Nv, D)
        acc = contrib if acc is None else acc + contrib

    attn_out = acc + bo_ref[...]                                           # (Nv, D)
    o_ref[0] = (x + gate_ref[0] * attn_out).astype(o_ref.dtype)


# ----------------------------------------------------------------------------
# Kernel 2: fused feed-forward branch (row-tiled)
# ----------------------------------------------------------------------------

def _fused_ff_kernel(gate_ref, x_ref, n2g_ref, n2b_ref,
                     w1a_ref, b1a_ref, w1g_ref, b1g_ref, w2_ref, b2_ref, o_ref):
    """out = x + tanh(alpha_dense) * GEGLU_FF(LN2(x))   for one row tile."""
    mm_dtype = x_ref.dtype
    x = x_ref[...].astype(jnp.float32)                    # (TM, D)

    mu = jnp.mean(x, axis=-1, keepdims=True)
    var = jnp.mean((x - mu) ** 2, axis=-1, keepdims=True)
    xn = ((x - mu) * jax.lax.rsqrt(var + 1e-5) * n2g_ref[...] + n2b_ref[...]).astype(mm_dtype)

    a = jnp.dot(xn, w1a_ref[...], preferred_element_type=jnp.float32) + b1a_ref[...]
    g = jnp.dot(xn, w1g_ref[...], preferred_element_type=jnp.float32) + b1g_ref[...]
    # exact (erf-based) GELU, matching torch.nn.functional.gelu default
    y = a * (0.5 * g * (1.0 + jax.lax.erf(g * (1.0 / math.sqrt(2.0)))))
    ff = (jnp.dot(y.astype(mm_dtype), w2_ref[...], preferred_element_type=jnp.float32)
          + b2_ref[...])
    o_ref[...] = (x + gate_ref[0] * ff).astype(o_ref.dtype)


# ----------------------------------------------------------------------------
# GatedSelfAttention forward (two pallas_calls total)
# ----------------------------------------------------------------------------

def gated_self_attention(x, objs, p, *, n_heads, d_head):
    """x: (B, Nv, query_dim); objs: (B, No, context_dim)."""
    B, Nv, D = x.shape
    No, Dctx = objs.shape[1], objs.shape[2]
    inner = n_heads * d_head
    attn_scale = d_head ** (-0.5)
    self_scale = 1.0  # module's self.scale

    # ---- host-side weight prep (cheap, once per call) --------------------------------
    # fold the softmax scale into the q columns; concatenate q|k|v into one weight.
    wqkv = jnp.concatenate([p["wq"] * attn_scale, p["wk"], p["wv"]], axis=1)   # (D, 3*inner)
    # pre-split GEGLU weight into value / gate halves (avoids an in-kernel split copy).
    ffi = p["ff_w2"].shape[0]
    w1a, w1g = p["ff_w1"][:, :ffi], p["ff_w1"][:, ffi:]
    b1a, b1g = p["ff_b1"][:, :ffi], p["ff_b1"][:, ffi:]
    # gates as SMEM scalars
    gate_attn = (self_scale * jnp.tanh(p["alpha_attn"])).reshape(1).astype(jnp.float32)
    gate_dense = (self_scale * jnp.tanh(p["alpha_dense"])).reshape(1).astype(jnp.float32)

    # ---- kernel 1: fused attention branch, grid over batch ---------------------------
    kern1 = functools.partial(_fused_attn_block_kernel, n_heads=n_heads, d_head=d_head)
    x_attn = pl.pallas_call(
        kern1,
        out_shape=jax.ShapeDtypeStruct((B, Nv, D), x.dtype),
        grid=(B,),
        in_specs=[
            pl.BlockSpec(memory_space=pltpu.MemorySpace.SMEM),       # gate_attn scalar
            pl.BlockSpec((1, Nv, D), lambda b: (b, 0, 0)),           # x
            pl.BlockSpec((1, No, Dctx), lambda b: (b, 0, 0)),        # objs
            pl.BlockSpec((Dctx, D), lambda b: (0, 0)),               # lin_w  (resident)
            pl.BlockSpec((1, D), lambda b: (0, 0)),                  # lin_b
            pl.BlockSpec((1, D), lambda b: (0, 0)),                  # n1_g
            pl.BlockSpec((1, D), lambda b: (0, 0)),                  # n1_b
            pl.BlockSpec((D, 3 * inner), lambda b: (0, 0)),          # wqkv   (resident)
            pl.BlockSpec((inner, D), lambda b: (0, 0)),              # wo     (resident)
            pl.BlockSpec((1, D), lambda b: (0, 0)),                  # bo
        ],
        out_specs=pl.BlockSpec((1, Nv, D), lambda b: (b, 0, 0)),
        compiler_params=pltpu.CompilerParams(dimension_semantics=("parallel",)),
    )(gate_attn, x, objs, p["lin_w"], p["lin_b"], p["n1_g"], p["n1_b"],
      wqkv, p["wo"], p["bo"])

    # ---- kernel 2: fused LN2 + GEGLU FF + gate + residual, row-tiled ------------------
    M = B * Nv
    x2d = x_attn.reshape(M, D)
    # Row tile: 256 keeps 2x(in+out)+f32 intermediates well under the 32 MiB default scoped
    # VMEM limit even on v7x (64 MiB physical); use the full extent when M is small.
    TM = M if M <= 256 else 256
    grid = (pl.cdiv(M, TM),)
    out2d = pl.pallas_call(
        _fused_ff_kernel,
        out_shape=jax.ShapeDtypeStruct((M, D), x.dtype),
        grid=grid,
        in_specs=[
            pl.BlockSpec(memory_space=pltpu.MemorySpace.SMEM),       # gate_dense scalar
            pl.BlockSpec((TM, D), lambda i: (i, 0)),                 # x rows
            pl.BlockSpec((1, D), lambda i: (0, 0)),                  # n2_g
            pl.BlockSpec((1, D), lambda i: (0, 0)),                  # n2_b
            pl.BlockSpec((D, ffi), lambda i: (0, 0)),                # w1 (value half)
            pl.BlockSpec((1, ffi), lambda i: (0, 0)),                # b1 (value half)
            pl.BlockSpec((D, ffi), lambda i: (0, 0)),                # w1 (gate half)
            pl.BlockSpec((1, ffi), lambda i: (0, 0)),                # b1 (gate half)
            pl.BlockSpec((ffi, D), lambda i: (0, 0)),                # w2
            pl.BlockSpec((1, D), lambda i: (0, 0)),                  # b2
        ],
        out_specs=pl.BlockSpec((TM, D), lambda i: (i, 0)),
        compiler_params=pltpu.CompilerParams(dimension_semantics=("parallel",)),
    )(gate_dense, x2d, p["n2_g"], p["n2_b"], w1a, b1a, w1g, b1g, p["ff_w2"], p["ff_b2"])

    return out2d.reshape(B, Nv, D)


# ----------------------------------------------------------------------------
# Pure-JAX reference (silent correctness check)
# ----------------------------------------------------------------------------

def _ref_forward(x, objs, p, *, n_heads, d_head):
    B, Nv, D = x.shape
    inner = n_heads * d_head

    def ln(t, g, b):
        mu = jnp.mean(t, axis=-1, keepdims=True)
        var = jnp.mean((t - mu) ** 2, axis=-1, keepdims=True)
        return (t - mu) * jax.lax.rsqrt(var + 1e-5) * g + b

    objs_p = objs @ p["lin_w"] + p["lin_b"]
    h = ln(jnp.concatenate([x, objs_p], axis=1), p["n1_g"], p["n1_b"])
    N = h.shape[1]
    q, k, v = h @ p["wq"], h @ p["wk"], h @ p["wv"]

    def heads(t):
        return t.reshape(B, N, n_heads, d_head).transpose(0, 2, 1, 3)

    qh, kh, vh = heads(q), heads(k), heads(v)
    sim = jnp.einsum("bhid,bhjd->bhij", qh, kh) * (d_head ** -0.5)
    attn = jax.nn.softmax(sim, axis=-1)
    o = jnp.einsum("bhij,bhjd->bhid", attn, vh).transpose(0, 2, 1, 3).reshape(B, N, inner)
    attn_out = o @ p["wo"] + p["bo"]
    x = x + jnp.tanh(p["alpha_attn"]) * attn_out[:, :Nv, :]

    xn = ln(x, p["n2_g"], p["n2_b"])
    hff = xn @ p["ff_w1"] + p["ff_b1"]
    a, g = jnp.split(hff, 2, axis=-1)
    y = a * (0.5 * g * (1.0 + jax.lax.erf(g / math.sqrt(2.0))))
    ff = y @ p["ff_w2"] + p["ff_b2"]
    return x + jnp.tanh(p["alpha_dense"]) * ff


# ----------------------------------------------------------------------------
# main
# ----------------------------------------------------------------------------

if __name__ == "__main__":
    key = jax.random.PRNGKey(0)
    B, Nv, No = 2, 16, 8
    query_dim, context_dim = 32, 16
    n_heads, d_head = 4, 8
    inner = n_heads * d_head
    ff_inner = 4 * query_dim  # 128

    ks = jax.random.split(key, 16)
    s = 0.05
    params = {
        "lin_w": s * jax.random.normal(ks[0], (context_dim, query_dim), jnp.float32),
        "lin_b": s * jax.random.normal(ks[1], (1, query_dim), jnp.float32),
        "n1_g": jnp.ones((1, query_dim), jnp.float32),
        "n1_b": jnp.zeros((1, query_dim), jnp.float32),
        "wq": s * jax.random.normal(ks[2], (query_dim, inner), jnp.float32),
        "wk": s * jax.random.normal(ks[3], (query_dim, inner), jnp.float32),
        "wv": s * jax.random.normal(ks[4], (query_dim, inner), jnp.float32),
        "wo": s * jax.random.normal(ks[5], (inner, query_dim), jnp.float32),
        "bo": s * jax.random.normal(ks[6], (1, query_dim), jnp.float32),
        "n2_g": jnp.ones((1, query_dim), jnp.float32),
        "n2_b": jnp.zeros((1, query_dim), jnp.float32),
        "ff_w1": s * jax.random.normal(ks[7], (query_dim, 2 * ff_inner), jnp.float32),
        "ff_b1": s * jax.random.normal(ks[8], (1, 2 * ff_inner), jnp.float32),
        "ff_w2": s * jax.random.normal(ks[9], (ff_inner, query_dim), jnp.float32),
        "ff_b2": s * jax.random.normal(ks[10], (1, query_dim), jnp.float32),
        # module __init__ sets these to 0.0 (which would zero out both gated branches);
        # use nonzero deterministic values so the kernels actually contribute.
        "alpha_attn": jnp.float32(0.5),
        "alpha_dense": jnp.float32(0.25),
    }

    x = jax.random.normal(ks[11], (B, Nv, query_dim), jnp.float32)
    objs = jax.random.normal(ks[12], (B, No, context_dim), jnp.float32)

    out = gated_self_attention(x, objs, params, n_heads=n_heads, d_head=d_head)
    out = jax.block_until_ready(out)

    ref = _ref_forward(x, objs, params, n_heads=n_heads, d_head=d_head)
    assert out.shape == (B, Nv, query_dim)
    # tolerance slightly looser than before because the softmax denominator uses the EUP
    # approximate reciprocal (relative error ~2^-12); observed error is far below this.
    assert jnp.allclose(out, ref, atol=1e-3, rtol=1e-3), "mismatch vs reference"

    print("KERNEL_OK")
</pallas_src>

<mosaic_0001>
module attributes {stable_mosaic.version = 11 : i64} {
  func.func @_fused_attn_block_kernel(%arg0: i32, %arg1: memref<1xf32, #tpu.memory_space<smem>>, %arg2: memref<1x16x32xf32, #tpu.memory_space<vmem>>, %arg3: memref<1x8x16xf32, #tpu.memory_space<vmem>>, %arg4: memref<16x32xf32, #tpu.memory_space<vmem>>, %arg5: memref<1x32xf32, #tpu.memory_space<vmem>>, %arg6: memref<1x32xf32, #tpu.memory_space<vmem>>, %arg7: memref<1x32xf32, #tpu.memory_space<vmem>>, %arg8: memref<32x96xf32, #tpu.memory_space<vmem>>, %arg9: memref<32x32xf32, #tpu.memory_space<vmem>>, %arg10: memref<1x32xf32, #tpu.memory_space<vmem>>, %arg11: memref<1x16x32xf32, #tpu.memory_space<vmem>>) attributes {dimension_semantics = [#tpu.dimension_semantics<parallel>], iteration_bounds = array<i64: 2>, scalar_prefetch = 0 : i64, scratch_operands = 0 : i64, tpu.core_type = #tpu.core_type<tc>, window_params = [{transform_indices = @transform_0, window_bounds = array<i64: 1>}, {transform_indices = @transform_1, window_bounds = array<i64: 1, 16, 32>}, {transform_indices = @transform_2, window_bounds = array<i64: 1, 8, 16>}, {pipeline_mode = #tpu.pipeline_mode<synchronous>, transform_indices = @transform_3, window_bounds = array<i64: 16, 32>}, {pipeline_mode = #tpu.pipeline_mode<synchronous>, transform_indices = @transform_4, window_bounds = array<i64: 1, 32>}, {pipeline_mode = #tpu.pipeline_mode<synchronous>, transform_indices = @transform_5, window_bounds = array<i64: 1, 32>}, {pipeline_mode = #tpu.pipeline_mode<synchronous>, transform_indices = @transform_6, window_bounds = array<i64: 1, 32>}, {pipeline_mode = #tpu.pipeline_mode<synchronous>, transform_indices = @transform_7, window_bounds = array<i64: 32, 96>}, {pipeline_mode = #tpu.pipeline_mode<synchronous>, transform_indices = @transform_8, window_bounds = array<i64: 32, 32>}, {pipeline_mode = #tpu.pipeline_mode<synchronous>, transform_indices = @transform_9, window_bounds = array<i64: 1, 32>}, {transform_indices = @transform_10, window_bounds = array<i64: 1, 16, 32>}]} {
    %c0 = arith.constant 0 : index
    %c0_0 = arith.constant 0 : index
    %c0_1 = arith.constant 0 : index
    %0 = vector.load %arg2[%c0, %c0_0, %c0_1] : memref<1x16x32xf32, #tpu.memory_space<vmem>>, vector<1x16x32xf32>
    %1 = vector.shape_cast %0 : vector<1x16x32xf32> to vector<16x32xf32>
    %c0_2 = arith.constant 0 : index
    %c0_3 = arith.constant 0 : index
    %c0_4 = arith.constant 0 : index
    %2 = vector.load %arg3[%c0_2, %c0_3, %c0_4] : memref<1x8x16xf32, #tpu.memory_space<vmem>>, vector<1x8x16xf32>
    %3 = vector.shape_cast %2 : vector<1x8x16xf32> to vector<8x16xf32>
    %c0_5 = arith.constant 0 : index
    %c0_6 = arith.constant 0 : index
    %4 = vector.load %arg4[%c0_5, %c0_6] : memref<16x32xf32, #tpu.memory_space<vmem>>, vector<16x32xf32>
    %cst = arith.constant dense<0.000000e+00> : vector<8x32xf32>
    %5 = tpu.matmul %3, %4, %cst {dimension_numbers = #tpu.dot_dimension_numbers<[1], [0], [0], [1], [0, 0, 1, 1], [], []>} : vector<8x16xf32>, vector<16x32xf32>, vector<8x32xf32> -> vector<8x32xf32>
    %c0_7 = arith.constant 0 : index
    %c0_8 = arith.constant 0 : index
    %6 = vector.load %arg5[%c0_7, %c0_8] : memref<1x32xf32, #tpu.memory_space<vmem>>, vector<1x32xf32>
    %7 = vector.broadcast %6 : vector<1x32xf32> to vector<8x32xf32>
    %8 = arith.addf %5, %7 : vector<8x32xf32>
    %cst_9 = arith.constant dense<0.000000e+00> : vector<16xf32>
    %9 = vector.multi_reduction <add>, %1, %cst_9 [1] : vector<16x32xf32> to vector<16xf32>
    %10 = vector.shape_cast %9 : vector<16xf32> to vector<16x1xf32>
    %cst_10 = arith.constant 3.200000e+01 : f32
    %11 = vector.broadcast %cst_10 : f32 to vector<16x1xf32>
    %12 = arith.divf %10, %11 : vector<16x1xf32>
    %13 = vector.broadcast %12 : vector<16x1xf32> to vector<16x32xf32>
    %14 = arith.subf %1, %13 : vector<16x32xf32>
    %15 = arith.mulf %14, %14 : vector<16x32xf32>
    %cst_11 = arith.constant dense<0.000000e+00> : vector<16xf32>
    %16 = vector.multi_reduction <add>, %15, %cst_11 [1] : vector<16x32xf32> to vector<16xf32>
    %17 = vector.shape_cast %16 : vector<16xf32> to vector<16x1xf32>
    %cst_12 = arith.constant 3.200000e+01 : f32
    %18 = vector.broadcast %cst_12 : f32 to vector<16x1xf32>
    %19 = arith.divf %17, %18 : vector<16x1xf32>
    %20 = vector.broadcast %12 : vector<16x1xf32> to vector<16x32xf32>
    %21 = arith.subf %1, %20 : vector<16x32xf32>
    %cst_13 = arith.constant 9.99999974E-6 : f32
    %22 = vector.broadcast %cst_13 : f32 to vector<16x1xf32>
    %23 = arith.addf %19, %22 : vector<16x1xf32>
    %24 = math.rsqrt %23 : vector<16x1xf32>
    %25 = vector.broadcast %24 : vector<16x1xf32> to vector<16x32xf32>
    %26 = arith.mulf %21, %25 : vector<16x32xf32>
    %c0_14 = arith.constant 0 : index
    %c0_15 = arith.constant 0 : index
    %27 = vector.load %arg6[%c0_14, %c0_15] : memref<1x32xf32, #tpu.memory_space<vmem>>, vector<1x32xf32>
    %28 = vector.broadcast %27 : vector<1x32xf32> to vector<16x32xf32>
    %29 = arith.mulf %26, %28 : vector<16x32xf32>
    %c0_16 = arith.constant 0 : index
    %c0_17 = arith.constant 0 : index
    %30 = vector.load %arg7[%c0_16, %c0_17] : memref<1x32xf32, #tpu.memory_space<vmem>>, vector<1x32xf32>
    %31 = vector.broadcast %30 : vector<1x32xf32> to vector<16x32xf32>
    %32 = arith.addf %29, %31 : vector<16x32xf32>
    %cst_18 = arith.constant dense<0.000000e+00> : vector<8xf32>
    %33 = vector.multi_reduction <add>, %8, %cst_18 [1] : vector<8x32xf32> to vector<8xf32>
    %34 = vector.shape_cast %33 : vector<8xf32> to vector<8x1xf32>
    %cst_19 = arith.constant 3.200000e+01 : f32
    %35 = vector.broadcast %cst_19 : f32 to vector<8x1xf32>
    %36 = arith.divf %34, %35 : vector<8x1xf32>
    %37 = vector.broadcast %36 : vector<8x1xf32> to vector<8x32xf32>
    %38 = arith.subf %8, %37 : vector<8x32xf32>
    %39 = arith.mulf %38, %38 : vector<8x32xf32>
    %cst_20 = arith.constant dense<0.000000e+00> : vector<8xf32>
    %40 = vector.multi_reduction <add>, %39, %cst_20 [1] : vector<8x32xf32> to vector<8xf32>
    %41 = vector.shape_cast %40 : vector<8xf32> to vector<8x1xf32>
    %cst_21 = arith.constant 3.200000e+01 : f32
    %42 = vector.broadcast %cst_21 : f32 to vector<8x1xf32>
    %43 = arith.divf %41, %42 : vector<8x1xf32>
    %44 = vector.broadcast %36 : vector<8x1xf32> to vector<8x32xf32>
    %45 = arith.subf %8, %44 : vector<8x32xf32>
    %cst_22 = arith.constant 9.99999974E-6 : f32
    %46 = vector.broadcast %cst_22 : f32 to vector<8x1xf32>
    %47 = arith.addf %43, %46 : vector<8x1xf32>
    %48 = math.rsqrt %47 : vector<8x1xf32>
    %49 = vector.broadcast %48 : vector<8x1xf32> to vector<8x32xf32>
    %50 = arith.mulf %45, %49 : vector<8x32xf32>
    %c0_23 = arith.constant 0 : index
    %c0_24 = arith.constant 0 : index
    %51 = vector.load %arg6[%c0_23, %c0_24] : memref<1x32xf32, #tpu.memory_space<vmem>>, vector<1x32xf32>
    %52 = vector.broadcast %51 : vector<1x32xf32> to vector<8x32xf32>
    %53 = arith.mulf %50, %52 : vector<8x32xf32>
    %c0_25 = arith.constant 0 : index
    %c0_26 = arith.constant 0 : index
    %54 = vector.load %arg7[%c0_25, %c0_26] : memref<1x32xf32, #tpu.memory_space<vmem>>, vector<1x32xf32>
    %55 = vector.broadcast %54 : vector<1x32xf32> to vector<8x32xf32>
    %56 = arith.addf %53, %55 : vector<8x32xf32>
    %57 = tpu.concatenate %32, %56 in 0 : vector<16x32xf32>, vector<8x32xf32> -> vector<24x32xf32>
    %c0_27 = arith.constant 0 : index
    %c0_28 = arith.constant 0 : index
    %58 = vector.load %arg8[%c0_27, %c0_28] : memref<32x96xf32, #tpu.memory_space<vmem>>, vector<32x96xf32>
    %cst_29 = arith.constant dense<0.000000e+00> : vector<24x96xf32>
    %59 = tpu.matmul %57, %58, %cst_29 {dimension_numbers = #tpu.dot_dimension_numbers<[1], [0], [0], [1], [0, 0, 1, 1], [], []>} : vector<24x32xf32>, vector<32x96xf32>, vector<24x96xf32> -> vector<24x96xf32>
    %60 = vector.extract_strided_slice %59 {offsets = [0, 0], sizes = [16, 32], strides = [1, 1]} : vector<24x96xf32> to vector<16x32xf32>
    %61 = vector.extract_strided_slice %59 {offsets = [0, 32], sizes = [24, 32], strides = [1, 1]} : vector<24x96xf32> to vector<24x32xf32>
    %62 = vector.extract_strided_slice %59 {offsets = [0, 64], sizes = [24, 32], strides = [1, 1]} : vector<24x96xf32> to vector<24x32xf32>
    %63 = vector.extract_strided_slice %60 {offsets = [0, 0], sizes = [16, 8], strides = [1, 1]} : vector<16x32xf32> to vector<16x8xf32>
    %64 = vector.extract_strided_slice %61 {offsets = [0, 0], sizes = [24, 8], strides = [1, 1]} : vector<24x32xf32> to vector<24x8xf32>
    %65 = vector.extract_strided_slice %62 {offsets = [0, 0], sizes = [24, 8], strides = [1, 1]} : vector<24x32xf32> to vector<24x8xf32>
    %cst_30 = arith.constant dense<0.000000e+00> : vector<16x24xf32>
    %66 = tpu.matmul %63, %64, %cst_30 {dimension_numbers = #tpu.dot_dimension_numbers<[1], [1], [0], [0], [0, 0, 1, 0], [], []>} : vector<16x8xf32>, vector<24x8xf32>, vector<16x24xf32> -> vector<16x24xf32>
    %cst_31 = arith.constant dense<0xFF800000> : vector<16xf32>
    %67 = vector.multi_reduction <maximumf>, %66, %cst_31 [1] : vector<16x24xf32> to vector<16xf32>
    %68 = vector.shape_cast %67 : vector<16xf32> to vector<16x1xf32>
    %69 = vector.broadcast %68 : vector<16x1xf32> to vector<16x24xf32>
    %70 = arith.subf %66, %69 : vector<16x24xf32>
    %71 = math.exp %70 : vector<16x24xf32>
    %cst_32 = arith.constant dense<0.000000e+00> : vector<16xf32>
    %72 = vector.multi_reduction <add>, %71, %cst_32 [1] : vector<16x24xf32> to vector<16xf32>
    %73 = vector.shape_cast %72 : vector<16xf32> to vector<16x1xf32>
    %74 = tpu.reciprocal %73 {approx = true} : vector<16x1xf32> -> vector<16x1xf32>
    %75 = vector.broadcast %74 : vector<16x1xf32> to vector<16x24xf32>
    %76 = arith.mulf %71, %75 : vector<16x24xf32>
    %cst_33 = arith.constant dense<0.000000e+00> : vector<16x8xf32>
    %77 = tpu.matmul %76, %65, %cst_33 {dimension_numbers = #tpu.dot_dimension_numbers<[1], [0], [0], [1], [0, 0, 1, 1], [], []>} : vector<16x24xf32>, vector<24x8xf32>, vector<16x8xf32> -> vector<16x8xf32>
    %c0_34 = arith.constant 0 : index
    %c0_35 = arith.constant 0 : index
    %78 = vector.load %arg9[%c0_34, %c0_35] : memref<32x32xf32, #tpu.memory_space<vmem>>, vector<8x32xf32>
    %cst_36 = arith.constant dense<0.000000e+00> : vector<16x32xf32>
    %79 = tpu.matmul %77, %78, %cst_36 {dimension_numbers = #tpu.dot_dimension_numbers<[1], [0], [0], [1], [0, 0, 1, 1], [], []>} : vector<16x8xf32>, vector<8x32xf32>, vector<16x32xf32> -> vector<16x32xf32>
    %80 = vector.extract_strided_slice %60 {offsets = [0, 8], sizes = [16, 8], strides = [1, 1]} : vector<16x32xf32> to vector<16x8xf32>
    %81 = vector.extract_strided_slice %61 {offsets = [0, 8], sizes = [24, 8], strides = [1, 1]} : vector<24x32xf32> to vector<24x8xf32>
    %82 = vector.extract_strided_slice %62 {offsets = [0, 8], sizes = [24, 8], strides = [1, 1]} : vector<24x32xf32> to vector<24x8xf32>
    %cst_37 = arith.constant dense<0.000000e+00> : vector<16x24xf32>
    %83 = tpu.matmul %80, %81, %cst_37 {dimension_numbers = #tpu.dot_dimension_numbers<[1], [1], [0], [0], [0, 0, 1, 0], [], []>} : vector<16x8xf32>, vector<24x8xf32>, vector<16x24xf32> -> vector<16x24xf32>
    %cst_38 = arith.constant dense<0xFF800000> : vector<16xf32>
    %84 = vector.multi_reduction <maximumf>, %83, %cst_38 [1] : vector<16x24xf32> to vector<16xf32>
    %85 = vector.shape_cast %84 : vector<16xf32> to vector<16x1xf32>
    %86 = vector.broadcast %85 : vector<16x1xf32> to vector<16x24xf32>
    %87 = arith.subf %83, %86 : vector<16x24xf32>
    %88 = math.exp %87 : vector<16x24xf32>
    %cst_39 = arith.constant dense<0.000000e+00> : vector<16xf32>
    %89 = vector.multi_reduction <add>, %88, %cst_39 [1] : vector<16x24xf32> to vector<16xf32>
    %90 = vector.shape_cast %89 : vector<16xf32> to vector<16x1xf32>
    %91 = tpu.reciprocal %90 {approx = true} : vector<16x1xf32> -> vector<16x1xf32>
    %92 = vector.broadcast %91 : vector<16x1xf32> to vector<16x24xf32>
    %93 = arith.mulf %88, %92 : vector<16x24xf32>
    %cst_40 = arith.constant dense<0.000000e+00> : vector<16x8xf32>
    %94 = tpu.matmul %93, %82, %cst_40 {dimension_numbers = #tpu.dot_dimension_numbers<[1], [0], [0], [1], [0, 0, 1, 1], [], []>} : vector<16x24xf32>, vector<24x8xf32>, vector<16x8xf32> -> vector<16x8xf32>
    %c8 = arith.constant 8 : index
    %c0_41 = arith.constant 0 : index
    %95 = vector.load %arg9[%c8, %c0_41] : memref<32x32xf32, #tpu.memory_space<vmem>>, vector<8x32xf32>
    %cst_42 = arith.constant dense<0.000000e+00> : vector<16x32xf32>
    %96 = tpu.matmul %94, %95, %cst_42 {dimension_numbers = #tpu.dot_dimension_numbers<[1], [0], [0], [1], [0, 0, 1, 1], [], []>} : vector<16x8xf32>, vector<8x32xf32>, vector<16x32xf32> -> vector<16x32xf32>
    %97 = arith.addf %79, %96 : vector<16x32xf32>
    %98 = vector.extract_strided_slice %60 {offsets = [0, 16], sizes = [16, 8], strides = [1, 1]} : vector<16x32xf32> to vector<16x8xf32>
    %99 = vector.extract_strided_slice %61 {offsets = [0, 16], sizes = [24, 8], strides = [1, 1]} : vector<24x32xf32> to vector<24x8xf32>
    %100 = vector.extract_strided_slice %62 {offsets = [0, 16], sizes = [24, 8], strides = [1, 1]} : vector<24x32xf32> to vector<24x8xf32>
    %cst_43 = arith.constant dense<0.000000e+00> : vector<16x24xf32>
    %101 = tpu.matmul %98, %99, %cst_43 {dimension_numbers = #tpu.dot_dimension_numbers<[1], [1], [0], [0], [0, 0, 1, 0], [], []>} : vector<16x8xf32>, vector<24x8xf32>, vector<16x24xf32> -> vector<16x24xf32>
    %cst_44 = arith.constant dense<0xFF800000> : vector<16xf32>
    %102 = vector.multi_reduction <maximumf>, %101, %cst_44 [1] : vector<16x24xf32> to vector<16xf32>
    %103 = vector.shape_cast %102 : vector<16xf32> to vector<16x1xf32>
    %104 = vector.broadcast %103 : vector<16x1xf32> to vector<16x24xf32>
    %105 = arith.subf %101, %104 : vector<16x24xf32>
    %106 = math.exp %105 : vector<16x24xf32>
    %cst_45 = arith.constant dense<0.000000e+00> : vector<16xf32>
    %107 = vector.multi_reduction <add>, %106, %cst_45 [1] : vector<16x24xf32> to vector<16xf32>
    %108 = vector.shape_cast %107 : vector<16xf32> to vector<16x1xf32>
    %109 = tpu.reciprocal %108 {approx = true} : vector<16x1xf32> -> vector<16x1xf32>
    %110 = vector.broadcast %109 : vector<16x1xf32> to vector<16x24xf32>
    %111 = arith.mulf %106, %110 : vector<16x24xf32>
    %cst_46 = arith.constant dense<0.000000e+00> : vector<16x8xf32>
    %112 = tpu.matmul %111, %100, %cst_46 {dimension_numbers = #tpu.dot_dimension_numbers<[1], [0], [0], [1], [0, 0, 1, 1], [], []>} : vector<16x24xf32>, vector<24x8xf32>, vector<16x8xf32> -> vector<16x8xf32>
    %c16 = arith.constant 16 : index
    %c0_47 = arith.constant 0 : index
    %113 = vector.load %arg9[%c16, %c0_47] : memref<32x32xf32, #tpu.memory_space<vmem>>, vector<8x32xf32>
    %cst_48 = arith.constant dense<0.000000e+00> : vector<16x32xf32>
    %114 = tpu.matmul %112, %113, %cst_48 {dimension_numbers = #tpu.dot_dimension_numbers<[1], [0], [0], [1], [0, 0, 1, 1], [], []>} : vector<16x8xf32>, vector<8x32xf32>, vector<16x32xf32> -> vector<16x32xf32>
    %115 = arith.addf %97, %114 : vector<16x32xf32>
    %116 = vector.extract_strided_slice %60 {offsets = [0, 24], sizes = [16, 8], strides = [1, 1]} : vector<16x32xf32> to vector<16x8xf32>
    %117 = vector.extract_strided_slice %61 {offsets = [0, 24], sizes = [24, 8], strides = [1, 1]} : vector<24x32xf32> to vector<24x8xf32>
    %118 = vector.extract_strided_slice %62 {offsets = [0, 24], sizes = [24, 8], strides = [1, 1]} : vector<24x32xf32> to vector<24x8xf32>
    %cst_49 = arith.constant dense<0.000000e+00> : vector<16x24xf32>
    %119 = tpu.matmul %116, %117, %cst_49 {dimension_numbers = #tpu.dot_dimension_numbers<[1], [1], [0], [0], [0, 0, 1, 0], [], []>} : vector<16x8xf32>, vector<24x8xf32>, vector<16x24xf32> -> vector<16x24xf32>
    %cst_50 = arith.constant dense<0xFF800000> : vector<16xf32>
    %120 = vector.multi_reduction <maximumf>, %119, %cst_50 [1] : vector<16x24xf32> to vector<16xf32>
    %121 = vector.shape_cast %120 : vector<16xf32> to vector<16x1xf32>
    %122 = vector.broadcast %121 : vector<16x1xf32> to vector<16x24xf32>
    %123 = arith.subf %119, %122 : vector<16x24xf32>
    %124 = math.exp %123 : vector<16x24xf32>
    %cst_51 = arith.constant dense<0.000000e+00> : vector<16xf32>
    %125 = vector.multi_reduction <add>, %124, %cst_51 [1] : vector<16x24xf32> to vector<16xf32>
    %126 = vector.shape_cast %125 : vector<16xf32> to vector<16x1xf32>
    %127 = tpu.reciprocal %126 {approx = true} : vector<16x1xf32> -> vector<16x1xf32>
    %128 = vector.broadcast %127 : vector<16x1xf32> to vector<16x24xf32>
    %129 = arith.mulf %124, %128 : vector<16x24xf32>
    %cst_52 = arith.constant dense<0.000000e+00> : vector<16x8xf32>
    %130 = tpu.matmul %129, %118, %cst_52 {dimension_numbers = #tpu.dot_dimension_numbers<[1], [0], [0], [1], [0, 0, 1, 1], [], []>} : vector<16x24xf32>, vector<24x8xf32>, vector<16x8xf32> -> vector<16x8xf32>
    %c24 = arith.constant 24 : index
    %c0_53 = arith.constant 0 : index
    %131 = vector.load %arg9[%c24, %c0_53] : memref<32x32xf32, #tpu.memory_space<vmem>>, vector<8x32xf32>
    %cst_54 = arith.constant dense<0.000000e+00> : vector<16x32xf32>
    %132 = tpu.matmul %130, %131, %cst_54 {dimension_numbers = #tpu.dot_dimension_numbers<[1], [0], [0], [1], [0, 0, 1, 1], [], []>} : vector<16x8xf32>, vector<8x32xf32>, vector<16x32xf32> -> vector<16x32xf32>
    %133 = arith.addf %115, %132 : vector<16x32xf32>
    %c0_55 = arith.constant 0 : index
    %c0_56 = arith.constant 0 : index
    %134 = vector.load %arg10[%c0_55, %c0_56] : memref<1x32xf32, #tpu.memory_space<vmem>>, vector<1x32xf32>
    %135 = vector.broadcast %134 : vector<1x32xf32> to vector<16x32xf32>
    %136 = arith.addf %133, %135 : vector<16x32xf32>
    %c0_57 = arith.constant 0 : index
    %137 = memref.load %arg1[%c0_57] : memref<1xf32, #tpu.memory_space<smem>>
    %138 = vector.broadcast %137 : f32 to vector<16x32xf32>
    %139 = arith.mulf %138, %136 : vector<16x32xf32>
    %140 = arith.addf %1, %139 : vector<16x32xf32>
    %c0_58 = arith.constant 0 : index
    %c0_59 = arith.constant 0 : index
    %c0_60 = arith.constant 0 : index
    %141 = vector.load %arg11[%c0_58, %c0_59, %c0_60] : memref<1x16x32xf32, #tpu.memory_space<vmem>>, vector<1x16x32xf32>
    %142 = vector.shape_cast %141 : vector<1x16x32xf32> to vector<16x32xf32>
    %143 = vector.shape_cast %140 : vector<16x32xf32> to vector<1x16x32xf32>
    tpu.vector_store %arg11[%c0_58, %c0_59, %c0_60], %143 {strides = array<i32>} : memref<1x16x32xf32, #tpu.memory_space<vmem>>, vector<1x16x32xf32>,
    return
  }
  func.func @transform_0(%arg0: i32) -> i32 {
    %c0_i32 = arith.constant 0 : i32
    %c0_i32_0 = arith.constant 0 : i32
    return %c0_i32 : i32
  }
  func.func @transform_1(%arg0: i32) -> (i32, i32, i32) {
    %c0_i32 = arith.constant 0 : i32
    %c0_i32_0 = arith.constant 0 : i32
    %c0_i32_1 = arith.constant 0 : i32
    return %arg0, %c0_i32, %c0_i32_0 : i32, i32, i32
  }
  func.func @transform_2(%arg0: i32) -> (i32, i32, i32) {
    %c0_i32 = arith.constant 0 : i32
    %c0_i32_0 = arith.constant 0 : i32
    %c0_i32_1 = arith.constant 0 : i32
    return %arg0, %c0_i32, %c0_i32_0 : i32, i32, i32
  }
  func.func @transform_3(%arg0: i32) -> (i32, i32) {
    %c0_i32 = arith.constant 0 : i32
    %c0_i32_0 = arith.constant 0 : i32
    %c0_i32_1 = arith.constant 0 : i32
    return %c0_i32, %c0_i32_0 : i32, i32
  }
  func.func @transform_4(%arg0: i32) -> (i32, i32) {
    %c0_i32 = arith.constant 0 : i32
    %c0_i32_0 = arith.constant 0 : i32
    %c0_i32_1 = arith.constant 0 : i32
    return %c0_i32, %c0_i32_0 : i32, i32
  }
  func.func @transform_5(%arg0: i32) -> (i32, i32) {
    %c0_i32 = arith.constant 0 : i32
    %c0_i32_0 = arith.constant 0 : i32
    %c0_i32_1 = arith.constant 0 : i32
    return %c0_i32, %c0_i32_0 : i32, i32
  }
  func.func @transform_6(%arg0: i32) -> (i32, i32) {
    %c0_i32 = arith.constant 0 : i32
    %c0_i32_0 = arith.constant 0 : i32
    %c0_i32_1 = arith.constant 0 : i32
    return %c0_i32, %c0_i32_0 : i32, i32
  }
  func.func @transform_7(%arg0: i32) -> (i32, i32) {
    %c0_i32 = arith.constant 0 : i32
    %c0_i32_0 = arith.constant 0 : i32
    %c0_i32_1 = arith.constant 0 : i32
    return %c0_i32, %c0_i32_0 : i32, i32
  }
  func.func @transform_8(%arg0: i32) -> (i32, i32) {
    %c0_i32 = arith.constant 0 : i32
    %c0_i32_0 = arith.constant 0 : i32
    %c0_i32_1 = arith.constant 0 : i32
    return %c0_i32, %c0_i32_0 : i32, i32
  }
  func.func @transform_9(%arg0: i32) -> (i32, i32) {
    %c0_i32 = arith.constant 0 : i32
    %c0_i32_0 = arith.constant 0 : i32
    %c0_i32_1 = arith.constant 0 : i32
    return %c0_i32, %c0_i32_0 : i32, i32
  }
  func.func @transform_10(%arg0: i32) -> (i32, i32, i32) {
    %c0_i32 = arith.constant 0 : i32
    %c0_i32_0 = arith.constant 0 : i32
    %c0_i32_1 = arith.constant 0 : i32
    return %arg0, %c0_i32, %c0_i32_0 : i32, i32, i32
  }
}

</mosaic_0001>

<bundles_post_ra>
// kernel: tpu_custom_call.1
= control target key start
LH: loop header
LB: loop body
LE: loop exit
PB: predicated region body
PF: predicated region fallthrough
CT: control target
= control target key end

     0   :  { %s3277_s0 = inlined_call_operand.<no memory space> [shape: f32[1], index: 0, kind: input, shape index: {}]   ;;  %s3278_s1 = inlined_call_operand.hbm [shape: f32[2,16,32], index: 1, kind: input, shape index: {}]   ;;  %s3279_s2 = inlined_call_operand.hbm [shape: f32[2,8,16], index: 2, kind: input, shape index: {}]   ;;  %s3280_s3 = inlined_call_operand.hbm [shape: f32[16,32], index: 3, kind: input, shape index: {}]   ;;  %s3281_s4 = inlined_call_operand.vmem [shape: f32[1,32], index: 4, kind: input, shape index: {}]   ;;  %s3282_s5 = inlined_call_operand.vmem [shape: f32[1,32], index: 5, kind: input, shape index: {}]   ;;  %s3283_s6 = inlined_call_operand.vmem [shape: f32[1,32], index: 6, kind: input, shape index: {}]   ;;  %s3284_s7 = inlined_call_operand.hbm [shape: f32[32,96], index: 7, kind: input, shape index: {}]   ;;  %s3285_s8 = inlined_call_operand.hbm [shape: f32[32,32], index: 8, kind: input, shape index: {}]   ;;  %s3286_s9 = inlined_call_operand.vmem [shape: f32[1,32], index: 9, kind: input, shape index: {}]   ;;  %s3287_s10 = inlined_call_operand.hbm [shape: f32[2,16,32], index: 10, kind: output, shape index: {}]  }
   0x1   :  { %3296 = sst [smem:[#allocation20_spill]] %s3278_s1 }
   0x2   :  { %3297 = sst [smem:[#allocation21_spill]] %s3280_s3 }
   0x3   :  { %3298 = sst [smem:[#allocation22_spill]] %s3284_s7 }
   0x4   :  { %3299 = sst [smem:[#allocation23_spill]] %s3285_s8 }
   0x5   :  { %3300 = sst [smem:[#allocation24_spill]] %s3287_s10 }
   0x6   :  { %15 = sst [smem:[#allocation2]] %s3277_s0 }
   0x7   :  { %16 = vsyncpa [#allocation4], 0 }
   0x8   :  { %18 = vsyncpa [#allocation4 + $0x1], 0 }
   0x9   :  { %19 = vsyncpa [#allocation7], 0 }
   0xa   :  { %21 = vsyncpa [#allocation7 + $0x1], 0 }
   0xb   :  { %22 = vsyncpa [#allocation10], 0 }
   0xc   :  { %23 = vsyncpa [#allocation5], 0 }
   0xd   :  { %25 = vsyncpa [#allocation5 + $0x1], 0  ;;  %s2801_s15 = smov 0   ;;  %s2803_s16 = smov 0  }
   0xe   :  { %s2805_s17 = smov 0   ;;  %s2807_s18 = smov 0  }
   0xf LB: > { %3301 = sst [smem:[#allocation18_spill]] %s2705_s15  ;;  %s2822_s0 = sadd.s32 4294967295, %s2717_s18   ;;  %s2717_s18 = sphi %s2807_s18, %s3334_s18   ;;  %s2713_s17 = sphi %s2805_s17, %s3333_s17   ;;  %s2709_s16 = sphi %s2803_s16, %s3332_s16   ;;  %s2705_s15 = sphi %s2801_s15, %s3331_s15  }
  0x10   : > { %s2015_s19 = sadd.s32 4294967294, %s2717_s18   ;;  %p72_p0 = scmp.ne.s32.totalorder %s2709_s16, %s2705_s15 }
  0x11   : > { %p3288_p1 = scmp.eq.s32.totalorder %s2822_s0, 0  ;;  %p275_p3 = scmp.eq.s32.totalorder %s2015_s19, 1 }
  0x12   : > { %p2016_p5 = scmp.ge.s32.totalorder %s2717_s18, 1  ;;  %p282_p7 = scmp.lt.s32.totalorder %s2717_s18, 3 }
  0x13   : > { %p2831_p4 = por %p3288_p1, %p72_p0  ;;  %p2836_p6 = por %p275_p3, %p72_p0 }
  0x14   : > { %p2841_p8 = pnand %p2016_p5, %p282_p7  ;;  %s2719_s23 = smov [#allocation8]  }
  0x15   : > { %s3302_s20 = scalar_select %p2831_p4, 1, 0 }
  0x16   : > { %s3303_s21 = scalar_select %p2836_p6, 1, 0 }
  0x17   : > { %s3305_s22 = scalar_select %p2841_p8, 1, 0 }
  0x18   : > { %3304 = sst [smem:[#allocation19_spill]] %s3303_s21  ;;  %s297_s24 = sshll.u32 %s2719_s23, 4  ;;  %s2845_s24 = int_to_ptr.vmem [resolvable:$true] %s297_s24 }
  0x19   : > { %p2335_p9 = pneg %p2841_p8  ;;  %s2720_s26 = smov [#allocation9]  }
  0x1a   : > { %s319_s27 = sshll.u32 %s2720_s26, 4  ;;  %s2721_s28 = smov [#allocation11]   ;;  %s2856_s27 = int_to_ptr.vmem [resolvable:$true] %s319_s27 }
  0x1b   : > { %p2852_p11 = pnand %p2335_p9, %p3288_p1  ;;  %s2858_s29 = sshll.u32 %s2721_s28, 4  ;;  %s333_s29 = int_to_ptr.vmem [resolvable:$true] %s2858_s29 }
  0x1c   : > { %s3307_s3 = sld [smem:[#allocation21_spill]] }
  0x1d   : > { %p2868_p13 = pneg %p2852_p11 }
  0x22   : > { %s2495_s12 = scalar_lea.hbm %s3307_s3, 256 }
  0x23   : > { %p2496_p12 = scmp.ne.s32.totalorder %s3307_s3, %s2495_s12  ;;  %p2502_p5 = scmp.lt.u32.totalorder %s2495_s12, %s3307_s3 }
  0x25   : > { %p2498_p0 = pnand %p2868_p13, %p2496_p12 }
  0x27   : > { %p2499_p3 = pneg %p2498_p0 }
  0x29   : > { %p2504_p7 = pnand %p2502_p5, %p2499_p3 }
  0x2b   : > { %2507 = shalt.err (!%p2504_p7)
}
  0x2c   : > { %s2508_s28 = scalar_lea.vmem %s2845_s24, 256  ;;  %p2516_p2 = scmp.lt.s32.totalorder %s2845_s24, %s2845_s24 }
  0x2d   : > { %p2509_p9 = scmp.ne.s32.totalorder %s2845_s24, %s2508_s28  ;;  %p2517_p6 = scmp.lt.s32.totalorder %s2508_s28, %s2508_s28 }
  0x2f   : > { %p2511_p10 = pnand %p2509_p9, %p2868_p13  ;;  %p2518_p12 = por %p2517_p6, %p2516_p2 }
  0x31   : > { %p2512_p1 = pneg %p2511_p10 }
  0x33   : > { %p2519_p0 = pnand %p2518_p12, %p2512_p1 }
  0x35   : > { %2522 = shalt.err (!%p2519_p0)
}
  0x36   : > { %s3294_s30 = smov 128   ;;  %s2723_s11 = smov 8  }
  0x37   : > { %2338 = dma.hbm_to_vmem [thread:$0]  (!%p2852_p11), %s3307_s3, 256, %s2845_s24, [#allocation7], %s3294_s30, %s3294_s30, %s2723_s11  }
  0x38   : > { %s3309_s7 = sld [smem:[#allocation22_spill]] }
  0x3e   : > { %s2523_s26 = scalar_lea.hbm %s3309_s7, 512 }
  0x3f   : > { %p2524_p1 = scmp.ne.s32.totalorder %s3309_s7, %s2523_s26  ;;  %p2530_p10 = scmp.lt.u32.totalorder %s2523_s26, %s3309_s7 }
  0x41   : > { %p2526_p2 = pnand %p2524_p1, %p2868_p13 }
  0x43   : > { %p2527_p6 = pneg %p2526_p2 }
  0x45   : > { %p2532_p3 = pnand %p2530_p10, %p2527_p6 }
  0x47   : > { %2535 = shalt.err (!%p2532_p3)
}
  0x48   : > { %s2536_s24 = scalar_lea.vmem %s2856_s27, 512  ;;  %p2544_p12 = scmp.lt.s32.totalorder %s2856_s27, %s2856_s27 }
  0x49   : > { %p2537_p5 = scmp.ne.s32.totalorder %s2856_s27, %s2536_s24  ;;  %p2545_p0 = scmp.lt.s32.totalorder %s2536_s24, %s2536_s24 }
  0x4b   : > { %p2539_p7 = pnand %p2537_p5, %p2868_p13  ;;  %p2546_p1 = por %p2545_p0, %p2544_p12 }
  0x4d   : > { %p2540_p9 = pneg %p2539_p7 }
  0x4f   : > { %p2547_p2 = pnand %p2546_p1, %p2540_p9 }
  0x51   : > { %2550 = shalt.err (!%p2547_p2)
}
  0x52   : > { %2341 = dma.hbm_to_vmem [thread:$0]  (!%p2852_p11), %s3309_s7, 512, %s2856_s27, [#allocation10], %s3294_s30, %s3294_s30, %s2723_s11  }
  0x53   : > { %s3310_s8 = sld [smem:[#allocation23_spill]] }
  0x59   : > { %s2551_s13 = scalar_lea.hbm %s3310_s8, 512 }
  0x5a   : > { %p2552_p6 = scmp.ne.s32.totalorder %s3310_s8, %s2551_s13  ;;  %p2558_p5 = scmp.lt.u32.totalorder %s2551_s13, %s3310_s8 }
  0x5c   : > { %p2554_p10 = pnand %p2552_p6, %p2868_p13 }
  0x5e   : > { %p2555_p3 = pneg %p2554_p10 }
  0x60   : > { %p2560_p7 = pnand %p2558_p5, %p2555_p3 }
  0x62   : > { %2563 = shalt.err (!%p2560_p7)
}
  0x63   : > { %s2564_s24 = scalar_lea.vmem %s333_s29, 512  ;;  %p2572_p1 = scmp.lt.s32.totalorder %s333_s29, %s333_s29 }
  0x64   : > { %p2565_p9 = scmp.ne.s32.totalorder %s333_s29, %s2564_s24  ;;  %p2573_p2 = scmp.lt.s32.totalorder %s2564_s24, %s2564_s24 }
  0x66   : > { %p2567_p12 = pnand %p2565_p9, %p2868_p13  ;;  %p2574_p4 = por %p2573_p2, %p2572_p1 }
  0x68   : > { %p2568_p0 = pneg %p2567_p12 }
  0x6a   : > { %p2575_p8 = pnand %p2574_p4, %p2568_p0 }
  0x6c   : > { %2578 = shalt.err (!%p2575_p8)
}
  0x6d   : > { %2344 = dma.hbm_to_vmem [thread:$0]  (!%p2852_p11), %s3310_s8, 512, %s333_s29, [#allocation10], %s3294_s30, %s3294_s30, %s2723_s11  }
  0x6e   : > { %s2941_s19 = sadd.s32 1, %s2717_s18   ;;  %s59_s15 = sadd.s32 1, %s2713_s17 }
  0x6f   : > { %s56_s25 = ssub.s32 %s2717_s18, %s2941_s19  ;;  %p66_p8 = scmp.ne.s32.totalorder %s2713_s17, %s2709_s16 }
  0x70   : > { %p57_p4 = scmp.eq.s32.totalorder %s56_s25, 0  ;;  %p67_p13 = scmp.eq.s32.totalorder %s2717_s18, 0 }
  0x71   : > { %p2359_p6 = scmp.lt.s32.totalorder %s2717_s18, 2  ;;  %p3311_p3 = scmp.eq.s32.totalorder %s2822_s0, 1 }
  0x72   : > { %s2951_s21 = scalar_select %p57_p4, %s2713_s17, %s59_s15  }
  0x73   : > { %p68_p10 = por %p67_p13, %p66_p8  ;;  %p2955_p5 = por %p3311_p3, %p66_p8 }
  0x74   : > { %s2960_s13 = sand.u32 1, %s2713_s17   ;;  %s2082_s29 = sshll.u32 %s2717_s18, 8 }
  0x75   : > { %s3312_s12 = scalar_select %p2955_p5, 1, 0 }
  0x76   : > { %s2021_s14 = sshll.u32 %s2960_s13, 4  ;;  %s3313_s1 = sld [smem:[#allocation20_spill]] }
  0x77   : > { %s353_s24 = scalar_lea.vmem [#allocation3], %s2021_s14  ;;  %p2969_p11 = pnand %p2359_p6, %p68_p10 }
  0x78   : > { %s360_s27 = sshll.u32 %s353_s24, 4  ;;  %s350_s15 = scalar_lea.sflag [#allocation4], %s2960_s13  ;;  %s2973_s27 = int_to_ptr.vmem [resolvable:$true] %s360_s27 }
  0x79   : > { %p2581_p9 = pneg %p2969_p11 }
  0x7c   : > { %s2967_s28 = scalar_lea.hbm %s3313_s1, %s2082_s29  ;;  %s2584_s23 = scalar_lea.hbm %s3313_s1, 512 }
  0x7d   : > { %s2579_s30 = scalar_lea.hbm %s2967_s28, 256  ;;  %p2585_p1 = scmp.lt.u32.totalorder %s2967_s28, %s3313_s1 }
  0x7e   : > { %p2580_p7 = scmp.ne.s32.totalorder %s2967_s28, %s2579_s30  ;;  %p2586_p2 = scmp.lt.u32.totalorder %s2584_s23, %s2579_s30 }
  0x7f   : > { %p2588_p8 = scmp.lt.u32.totalorder %s2579_s30, %s2967_s28 }
  0x80   : > { %p2582_p12 = pnand %p2581_p9, %p2580_p7  ;;  %p2587_p4 = por %p2586_p2, %p2585_p1 }
  0x82   : > { %p2583_p0 = pneg %p2582_p12  ;;  %p2589_p13 = por %p2588_p8, %p2587_p4 }
  0x84   : > { %p2590_p6 = pnand %p2589_p13, %p2583_p0 }
  0x86   : > { %2593 = shalt.err (!%p2590_p6)
}
  0x87   : > { %s2594_s25 = scalar_lea.vmem %s2973_s27, 256  ;;  %s2724_s29 = smov [#allocation3]  }
  0x88   : > { %p2595_p10 = scmp.ne.s32.totalorder %s2973_s27, %s2594_s25  ;;  %s2599_s14 = sshll.u32 %s2724_s29, 4  ;;  %s2600_s14 = int_to_ptr.vmem [resolvable:$false] %s2599_s14 }
  0x89   : > { %s2601_s26 = scalar_lea.vmem %s2600_s14, 512  ;;  %p2602_p12 = scmp.lt.s32.totalorder %s2973_s27, %s2600_s14 }
  0x8a   : > { %p2597_p3 = pnand %p2595_p10, %p2581_p9  ;;  %p2603_p1 = scmp.lt.s32.totalorder %s2601_s26, %s2594_s25 }
  0x8c   : > { %p2598_p7 = pneg %p2597_p3  ;;  %p2604_p2 = por %p2603_p1, %p2602_p12 }
  0x8e   : > { %p2605_p4 = pnand %p2604_p2, %p2598_p7 }
  0x90   : > { %2608 = shalt.err (!%p2605_p4)
}
  0x91   : > { %s3315_s30 = smov 128   ;;  %s2024_s23 = sshll.u32 %s2960_s13, 3 }
  0x92   : > { %2348 = dma.hbm_to_vmem [thread:$0]  (!%p2969_p11), %s2967_s28, 256, %s2973_s27, %s350_s15, %s3315_s30, %s3315_s30, %s2723_s11  }
  0x93   : > { %s2025_s24 = sshll.u32 %s2717_s18, 7  ;;  %s374_s26 = scalar_lea.vmem [#allocation6], %s2024_s23 }
  0x94   : > { %s3012_s14 = scalar_lea.hbm %s3279_s2, %s2025_s24  ;;  %s381_s1 = sshll.u32 %s374_s26, 4  ;;  %s382_s1 = int_to_ptr.vmem [resolvable:$true] %s381_s1 }
  0x95   : > { %s3316_s3 = sand.u32 1, %s2717_s18   ;;  %s2609_s8 = scalar_lea.hbm %s3012_s14, 128 }
  0x96   : > { %s371_s7 = scalar_lea.sflag [#allocation7], %s3316_s3  ;;  %p2610_p0 = scmp.ne.s32.totalorder %s3012_s14, %s2609_s8 }
  0x97   : > { %s2614_s28 = scalar_lea.hbm %s3279_s2, 256  ;;  %p2615_p6 = scmp.lt.u32.totalorder %s3012_s14, %s3279_s2 }
  0x98   : > { %p2612_p8 = pnand %p2610_p0, %p2581_p9  ;;  %p2616_p10 = scmp.lt.u32.totalorder %s2614_s28, %s2609_s8 }
  0x99   : > { %p2618_p7 = scmp.lt.u32.totalorder %s2609_s8, %s3012_s14 }
  0x9a   : > { %p2613_p13 = pneg %p2612_p8  ;;  %p2617_p3 = por %p2616_p10, %p2615_p6 }
  0x9c   : > { %p2619_p12 = por %p2618_p7, %p2617_p3 }
  0x9e   : > { %p2620_p1 = pnand %p2619_p12, %p2613_p13 }
  0xa0   : > { %2623 = shalt.err (!%p2620_p1)
}
  0xa1   : > { %s2624_s3 = scalar_lea.vmem %s382_s1, 128  ;;  %s2725_s30 = smov [#allocation6]  }
  0xa2   : > { %p2625_p2 = scmp.ne.s32.totalorder %s382_s1, %s2624_s3  ;;  %s2629_s23 = sshll.u32 %s2725_s30, 4  ;;  %s2630_s23 = int_to_ptr.vmem [resolvable:$false] %s2629_s23 }
  0xa3   : > { %s2631_s24 = scalar_lea.vmem %s2630_s23, 256  ;;  %p2632_p8 = scmp.lt.s32.totalorder %s382_s1, %s2630_s23 }
  0xa4   : > { %p2627_p4 = pnand %p2625_p2, %p2581_p9  ;;  %p2633_p5 = scmp.lt.s32.totalorder %s2631_s24, %s2624_s3 }
  0xa6   : > { %p2628_p0 = pneg %p2627_p4  ;;  %p2634_p6 = por %p2633_p5, %p2632_p8 }
  0xa8   : > { %p2635_p10 = pnand %p2634_p6, %p2628_p0 }
  0xaa   : > { %2638 = shalt.err (!%p2635_p10)
}
  0xab   : > { %2351 = dma.hbm_to_vmem [thread:$0]  (!%p2969_p11), %s3012_s14, 128, %s382_s1, %s371_s7  }
  0xac   : > { %p3317_p13 = scmp.ne.s32.totalorder %s3305_s22, 0 }
  0xad   : > { %s3038_s8 = sand.u32 (!%p3317_p13), 1, %s2709_s16   ;;  %p3318_p5 = scmp.ne.s32.totalorder (!%p3317_p13), %s3302_s20, 0 }
  0xae   : > { %390 = sbr.rel (%p3317_p13) target bundleno = 2586 (0xa1a), region = 60  ;;  %s2027_s25 = sshll.u32 (!%p3317_p13), %s3038_s8, 4 }
  0xaf   : > { %s393_s29 = scalar_lea.sflag (!%p3317_p13), [#allocation4], %s3038_s8  ;;  %s396_s26 = scalar_lea.vmem (!%p3317_p13), [#allocation3], %s2027_s25 }
  0xb5   : > { %2684 = dma.done.wait (%p3318_p5), %s393_s29, 256  }
  0xb6   : > { %2686 = vsyncadd (%p3318_p5), %s393_s29, 4294967040  ;;  %s401_s1 = sand.u32 1, %s2822_s0   ;;  %s2028_s7 = sshll.u32 %s3038_s8, 3 }
  0xb7   : > { %s402_s22 = scalar_lea.sflag [#allocation7], %s401_s1  ;;  %s405_s10 = scalar_lea.vmem [#allocation6], %s2028_s7 }
  0xb8   : > { %2688 = dma.done.wait (%p3318_p5), %s402_s22, 128  }
  0xb9   : > { %2690 = vsyncadd (%p3318_p5), %s402_s22, 4294967168  ;;  %p3319_p11 = scmp.eq.s32.totalorder %s2822_s0, 0 }
  0xbb   : > { %2692 = dma.done.wait (%p3319_p11), [#allocation7], 256   ;;  %p3320_p9 = pmov %p3319_p11 }
  0xbd   : > { %2694 = vsyncadd (%p3320_p9), [#allocation7], 4294967040  ;;  %p3321_p3 = pmov %p3320_p9 }
  0xbf   : > { %2696 = dma.done.wait (%p3321_p3), [#allocation10], 1024   ;;  %p3322_p7 = pmov %p3321_p3 }
  0xc0   : > { %v2726_v0 = vmov 0.0|0.0   ;;  %vm2727_vm0 = vmmov 0   ;;  %v2728_v1 = vmov 0.0   ;;  %vm545_vm1 = vcmask 261120   ;;  %v462_v2 = vld [vmem:[#allocation8] sm:$0xff]  ;;  %v463_v3 = vld [vmem:[#allocation8 + $0x8] sm:$0xff] }
  0xc1   : > { %2698 = vsyncadd (%p3322_p7), [#allocation10], 4294966272  ;;  %2262 = vmatprep.subr.bf16.mxu0 %v2726_v0  ;;  %2150 = vmatprep.mubr.msk.f32.mxu0 %vm2727_vm0, %v2728_v1  ;;  %v2263_v4 = vpack.c.bf16 %v463_v3, %v462_v2  ;;  %v3066_v5 = vld [vmem:[%s396_s26] sm:$0xff]  ;;  %v3068_v6 = vld [vmem:[%s396_s26 + $0x8] sm:$0xff]  ;;  %vm471_vm2 = vcmask 130048   ;;  %vm708_vm3 = vcmask 64512  }
  0xc2   : > { %2265 = vmatprep.subr.bf16.mxu1 %v2726_v0  ;;  %2161 = vmatprep.mubr.msk.f32.mxu1 %vm2727_vm0, %v2728_v1  ;;  %v546_v7 = vsel %vm545_vm1, %v3066_v5, 0.0  ;;  %v461_v8 = vld [vmem:[%s405_s10] sm:$0xff]  ;;  %v549_v9 = vsel %vm545_vm1, %v3068_v6, 0.0  ;;  %v608_v27 = vld [vmem:[#allocation9 + $0x10] sm:$0xff]  ;;  %v609_v29 = vld [vmem:[#allocation9 + $0x18] sm:$0xff]  ;;  %s2729_s15 = smov 96  }
  0xc3   : > { %2264 = vmatpush3.bf16.msra.mxu0 %v2263_v4  ;;  %547 = vadd.xlane.f32.xlu0 %v546_v7  ;;  %v2033_v18 = vld [vmem:[%s3281_s4] ss:$0 sm:$0xff]  ;;  %v607_v26 = vld [vmem:[#allocation9 + $0x8] sm:$0xff]  ;;  %v2269_v30 = vpack.c.bf16 %v609_v29, %v608_v27  ;;  %s2730_s3 = smov 120   ;;  %s2731_s30 = smov 80   ;;  %vm3112_vm4 = vmpackc.low %vm708_vm3, %vm708_vm3  ;;  %vm794_vm5 = vcmask 195584  }
  0xc4   : > { %v606_v25 = vld [vmem:[#allocation9] sm:$0xff]  ;;  %s2732_s23 = smov 112   ;;  %s2733_s24 = smov 88  }
  0xc5   : > { %v2266_v28 = vpack.c.bf16 %v607_v26, %v606_v25  ;;  %v2035_v46 = vld [vmem:[%s3282_s5] ss:$0 sm:$0xff]  ;;  %s2734_s29 = smov 64   ;;  %s2735_s26 = smov 56  }
  0xc6   : > { %2151 = vmatmul.mubr.msk.f32.vlgmr.msra.gmra.mrb[0].mxu0 %vm471_vm2, %v461_v8  ;;  %v2036_v48 = vld [vmem:[%s3283_s6] ss:$0 sm:$0xff]  ;;  %s2736_s1 = smov 72   ;;  %s2737_s7 = smov 104  }
  0xc7   : > { %550 = vadd.xlane.f32.xlu0 %v549_v9  ;;  %2267 = vmatpush3.bf16.msra.mxu1 %v2266_v28  ;;  %s2738_s22 = smov 48   ;;  %s2739_s10 = smov 40  }
  0xc8   : > { %2268 = vmatprep.subr.bf16.mxu1 %v2726_v0  ;;  %s1869_s20 = sld [smem:[#allocation2]]  ;;  %s2083_s13 = sshll.u32 %s2822_s0, 8 }
  0xc9   : > { %s458_s28 = scalar_lea.vmem [#allocation12], %s2027_s25  ;;  %s1878_s0 = scalar_lea.sflag [#allocation5], %s3038_s8 }
  0xca   : > { %s1891_s27 = sshll.u32 %s458_s28, 4  ;;  %p3326_p1 = scmp.ne.s32.totalorder %s3312_s12, 0  ;;  %s3230_s27 = int_to_ptr.vmem [resolvable:$true] %s1891_s27 }
  0xcb   : > { %2270 = vmatpush3.bf16.msra.mxu1 %v2269_v30  ;;  %s2639_s25 = scalar_lea.vmem %s3230_s27, 256 }
  0xcc   : > { %p2640_p12 = scmp.ne.s32.totalorder %s3230_s27, %s2639_s25 }
  0xce   : > { %p2641_p2 = pnand %p2640_p12, %p3326_p1 }
  0xd0   : > { %p2642_p4 = pneg %p2641_p2 }
 0x150   : > { %v548_v10 = vpop.xlane.xlu0 %547 }
 0x151   : > { %v553_v16 = vmul.f32 0.03125, %v548_v10 }
 0x153   : > { %v555_v17 = vsub.f32 %v3066_v5, %v553_v16 }
 0x154   : > { %v551_v11 = vpop.xlane.xlu0 %550 }
 0x155   : > { %v554_v12 = vmul.f32 0.03125, %v551_v11  ;;  %v557_v22 = vmul.f32 %v555_v17, %v555_v17 }
 0x157   : > { %v556_v13 = vsub.f32 %v3068_v6, %v554_v12  ;;  %v559_v24 = vsel %vm545_vm1, %v557_v22, 0.0 }
 0x159   : > { %v558_v14 = vmul.f32 %v556_v13, %v556_v13 }
 0x15b   : > { %v562_v15 = vsel %vm545_vm1, %v558_v14, 0.0 }
 0x15c   : > { %563 = vadd.xlane.f32.xlu0 %v562_v15 }
 0x199   : > { %v541_v19 = vpop.f32.mrb[0].mxu0 }
 0x19a   : > { %v542_v20 = vadd.f32 %v2033_v18, %v541_v19  ;;  %v2152_v21 = vpop.f32.mrb[1].mxu0 }
 0x19c   : > { %v591_v23 = vsel %vm545_vm1, %v542_v20, 0.0 }
 0x19d   : > { %592 = vadd.xlane.f32.xlu1 %v591_v23 }
 0x1a1   : > { %560 = vadd.xlane.f32.xlu1 %v559_v24 }
 0x1e9   : > { %v564_v31 = vpop.xlane.xlu0 %563 }
 0x1ea   : > { %v566_v32 = vmul.f32 0.03125, %v564_v31 }
 0x1ec   : > { %v568_v35 = vadd.f32 1e-05, %v566_v32 }
 0x1ee   : > { %2457 = vrsqrt.f32 %v568_v35 }
 0x1f8   : > { %v2458_v42 = vpop.eup %2457 }
 0x1f9   : > { %v572_v45 = vmul.f32 %v2458_v42, %v556_v13 }
 0x1fb   : > { %v581_v50 = vmul.f32 %v2035_v46, %v572_v45 }
 0x1fd   : > { %v590_v51 = vadd.f32 %v2036_v48, %v581_v50 }
 0x22a   : > { %v593_v33 = vpop.xlane.xlu1 %592 }
 0x22b   : > { %v594_v34 = vmul.f32 0.03125, %v593_v33 }
 0x22d   : > { %v595_v36 = vsub.f32 %v542_v20, %v594_v34 }
 0x22e   : > { %v561_v37 = vpop.xlane.xlu1 %560 }
 0x22f   : > { %v565_v38 = vmul.f32 0.03125, %v561_v37  ;;  %v596_v39 = vmul.f32 %v595_v36, %v595_v36 }
 0x231   : > { %v567_v40 = vadd.f32 1e-05, %v565_v38  ;;  %v597_v41 = vsel %vm545_vm1, %v596_v39, 0.0 }
 0x232   : > { %598 = vadd.xlane.f32.xlu1 %v597_v41 }
 0x233   : > { %2459 = vrsqrt.f32 %v567_v40 }
 0x23d   : > { %v2460_v43 = vpop.eup %2459 }
 0x23e   : > { %v571_v44 = vmul.f32 %v2460_v43, %v555_v17 }
 0x240   : > { %v580_v47 = vmul.f32 %v2035_v46, %v571_v44 }
 0x242   : > { %v589_v49 = vadd.f32 %v2036_v48, %v580_v47 }
 0x244   : > { %2162 = vmatmul.mubr.msk.f32.vlgmr.msra.gmra.mrb[0].mxu1 %vm545_vm1, %v589_v49 }
 0x245   : > { %2164 = vmatprep.mubr.msk.f32.mxu1 %vm2727_vm0, %v2728_v1 }
 0x248   : > { %2165 = vmatmul.mubr.msk.f32.gmra.mrb[2].mxu1 %vm545_vm1, %v590_v51 }
 0x249   : > { %2167 = vmatprep.mubr.msk.f32.mxu1 %vm2727_vm0, %v2728_v1 }
 0x2bf   : > { %v599_v52 = vpop.xlane.xlu1 %598 }
 0x2c0   : > { %v600_v53 = vmul.f32 0.03125, %v599_v52 }
 0x2c2   : > { %v601_v54 = vadd.f32 1e-05, %v600_v53 }
 0x2c4   : > { %2461 = vrsqrt.f32 %v601_v54 }
 0x2ce   : > { %v2462_v55 = vpop.eup %2461 }
 0x2cf   : > { %v603_v56 = vmul.f32 %v2462_v55, %v595_v36 }
 0x2d1   : > { %v604_v57 = vmul.f32 %v2035_v46, %v603_v56 }
 0x2d3   : > { %v605_v58 = vadd.f32 %v2036_v48, %v604_v57 }
 0x2d5   : > { %2168 = vmatmul.mubr.msk.f32.gmra.mrb[4].mxu1 %vm545_vm1, %v605_v58 }
 0x317   : > { %v3096_v59 = vpop.f32.mrb[0].mxu1 }
 0x318   : > { %v2163_v60 = vpop.f32.mrb[1].mxu1  ;;  %2176 = vmatprep.mubr.msk.f32.mxu0 %vm708_vm3, %v3096_v59 }
 0x31b   : > { %v3100_v61 = vpop.f32.mrb[2].mxu1 }
 0x31c   : > { %v2166_v62 = vpop.f32.mrb[3].mxu1  ;;  %v3104_v63 = vpack.i.bf16 %v3100_v61, %v3096_v59 }
 0x31e   : > { %2418 = vrot.lane.b32.xlu0 %v3104_v63, %s2729_s15 }
 0x322   : > { %908 = vrot.lane.b32.xlu0 %v3096_v59, %s2730_s3 }
 0x326   : > { %2428 = vrot.lane.b32.xlu0 %v3104_v63, %s2731_s30 }
 0x32a   : > { %1278 = vrot.lane.b32.xlu0 %v3096_v59, %s2732_s23 }
 0x390   : > { %v2419_v0 = vpop.permute.xlu0 %2418 }
 0x391   : > { %v2421_v1 = vunpack.i.h.bf16 %v2419_v0  ;;  %v2420_v2 = vunpack.i.l.bf16 %v2419_v0 }
 0x393   : > { %v2271_v4 = vpack.c.bf16 %v2421_v1, %v2420_v2 }
 0x394   : > { %v909_v10 = vpop.permute.xlu0 %908 }
 0x395   : > { %2273 = vmatprep.subr.msk.bf16.mxu0 %vm3112_vm4, %v2271_v4 }
 0x396   : > { %2276 = vmatpush3.bf16.xpose.msk.msra.mxu0 %vm3112_vm4, %v2271_v4 }
 0x398   : > { %v2429_v15 = vpop.permute.xlu0 %2428 }
 0x399   : > { %v2431_v17 = vunpack.i.h.bf16 %v2429_v15  ;;  %v2430_v18 = vunpack.i.l.bf16 %v2429_v15 }
 0x39b   : > { %v2291_v20 = vpack.c.bf16 %v2431_v17, %v2430_v18 }
 0x39c   : > { %v1279_v21 = vpop.permute.xlu0 %1278 }
 0x3a8   : > { %v3120_v7 = vpop.f32.mrb[4].mxu1 }
 0x3a9   : > { %706 = vrot.lane.b32.xlu1 %v3120_v7, %s2729_s15  ;;  %v2169_v8 = vpop.f32.mrb[5].mxu1 }
 0x3ad   : > { %2423 = vrot.lane.b32.xlu1 %v3104_v63, %s2733_s24 }
 0x3b1   : > { %916 = vrot.lane.b32.xlu1 %v3120_v7, %s2733_s24  ;;  %s2740_s24 = smov [#allocation12]  }
 0x3b5   : > { %910 = vrot.lane.b32.xlu1 %v3100_v61, %s2730_s3 }
 0x3b9   : > { %1286 = vrot.lane.b32.xlu1 %v3120_v7, %s2731_s30  ;;  %s3325_s30 = sld [smem:[#allocation24_spill]] }
 0x3bd   : > { %1280 = vrot.lane.b32.xlu1 %v3100_v61, %s2732_s23 }
 0x3bf   : > { %s3228_s23 = scalar_lea.hbm %s3325_s30, %s2083_s13 }
 0x41b   : > { %v707_v9 = vpop.permute.xlu1 %706 }
 0x41c   : > { %2174 = vmatprep.subr.msk.mxu0 %vm708_vm3, %v707_v9 }
 0x41d   : > { %2175 = vmatpush3.xpose.msk.msra.mxu0 %vm708_vm3, %v707_v9 }
 0x41f   : > { %v2424_v11 = vpop.permute.xlu1 %2423 }
 0x420   : > { %v2426_v12 = vunpack.i.h.bf16 %v2424_v11  ;;  %v2425_v13 = vunpack.i.l.bf16 %v2424_v11  ;;  %2177 = vmatmul.mubr.msk.f32.vlgmr.msra.gmra.mrb[2].mxu0 %vm708_vm3, %v3100_v61 }
 0x421   : > { %2194 = vmatprep.mubr.msk.f32.mxu0 %vm708_vm3, %v909_v10 }
 0x422   : > { %v2281_v14 = vpack.c.bf16 %v2426_v12, %v2425_v13 }
 0x423   : > { %v917_v16 = vpop.permute.xlu1 %916 }
 0x424   : > { %2283 = vmatprep.subr.msk.bf16.mxu0 %vm3112_vm4, %v2281_v14 }
 0x425   : > { %2286 = vmatpush3.bf16.xpose.msk.msra.mxu0 %vm3112_vm4, %v2281_v14 }
 0x426   : > { %2192 = vmatprep.subr.msk.mxu0 %vm708_vm3, %v917_v16 }
 0x427   : > { %v911_v19 = vpop.permute.xlu1 %910 }
 0x42b   : > { %v1287_v22 = vpop.permute.xlu1 %1286 }
 0x42d   : > { %2193 = vmatpush3.xpose.msk.msra.mxu0 %vm708_vm3, %v917_v16 }
 0x42e   : > { %2293 = vmatprep.subr.msk.bf16.mxu0 %vm3112_vm4, %v2291_v20 }
 0x42f   : > { %v1281_v23 = vpop.permute.xlu1 %1280 }
 0x430   : > { %2195 = vmatmul.mubr.msk.f32.vlgmr.msra.gmra.mrb[4].mxu0 %vm708_vm3, %v911_v19 }
 0x431   : > { %2296 = vmatpush3.bf16.xpose.msk.msra.mxu0 %vm3112_vm4, %v2291_v20  ;;  %2222 = vmatprep.mubr.msk.f32.mxu0 %vm708_vm3, %v1279_v21 }
 0x432   : > { %2220 = vmatprep.subr.msk.mxu0 %vm708_vm3, %v1287_v22 }
 0x439   : > { %2221 = vmatpush3.xpose.msk.msra.mxu0 %vm708_vm3, %v1287_v22 }
 0x43c   : > { %2223 = vmatmul.mubr.msk.f32.vlgmr.msra.gmra.mrb[6].mxu0 %vm708_vm3, %v1281_v23 }
 0x4f3   : > { %v2178_v24 = vpop.f32.mrb[2].mxu0 }
 0x4f4   : > { %v785_v25 = vpop.f32.mrb[3].mxu0  ;;  %v798_v26 = vsel %vm794_vm5, %v2178_v24, -inf }
 0x4f5   : > { %799 = vmax.xlane.f32.xlu1 %v798_v26  ;;  %v795_v27 = vsel %vm794_vm5, %v785_v25, -inf }
 0x4f6   : > { %796 = vmax.xlane.f32.xlu0 %v795_v27 }
 0x503   : > { %v2196_v28 = vpop.f32.mrb[4].mxu0 }
 0x504   : > { %v994_v29 = vpop.f32.mrb[5].mxu0  ;;  %v1006_v31 = vsel %vm794_vm5, %v2196_v28, -inf }
 0x505   : > { %v1003_v30 = vsel %vm794_vm5, %v994_v29, -inf }
 0x506   : > { %1004 = vmax.xlane.f32.xlu0 %v1003_v30 }
 0x50a   : > { %1007 = vmax.xlane.f32.xlu0 %v1006_v31 }
 0x50f   : > { %v3152_v32 = vpop.f32.mrb[6].mxu0 }
 0x510   : > { %v3154_v33 = vpop.f32.mrb[7].mxu0  ;;  %v1376_v55 = vsel %vm794_vm5, %v3152_v32, -inf }
 0x511   : > { %v1373_v54 = vsel %vm794_vm5, %v3154_v33, -inf }
 0x582   : > { %v800_v34 = vpop.xlane.xlu1 %799 }
 0x583   : > { %v802_v35 = vsub.f32 %v2178_v24, %v800_v34  ;;  %v797_v36 = vpop.xlane.xlu0 %796 }
 0x584   : > { %v801_v37 = vsub.f32 %v785_v25, %v797_v36 }
 0x585   : > { %v805_v38 = vmul.f32 1.442695, %v802_v35 }
 0x586   : > { %v803_v39 = vmul.f32 1.442695, %v801_v37  ;;  %v1115_v37 = vld [vmem:[#allocation11 + $0x8] sm:$0xff] }
 0x587   : > { %2463 = vpow2.f32 %v805_v38  ;;  %v907_v38 = vld [vmem:[#allocation11] sm:$0xff] }
 0x588   : > { %2465 = vpow2.f32 %v803_v39 }
 0x591   : > { %v3156_v40 = vpop.eup %2463 }
 0x592   : > { %v2466_v41 = vpop.eup %2465  ;;  %v810_v42 = vsel %vm794_vm5, %v3156_v40, 0.0 }
 0x593   : > { %811 = vadd.xlane.f32.xlu1 %v810_v42  ;;  %v1005_v43 = vpop.xlane.xlu0 %1004  ;;  %v807_v44 = vsel %vm794_vm5, %v2466_v41, 0.0 }
 0x594   : > { %v1009_v45 = vsub.f32 %v994_v29, %v1005_v43  ;;  %808 = vadd.xlane.f32.xlu0 %v807_v44 }
 0x596   : > { %v1011_v46 = vmul.f32 1.442695, %v1009_v45 }
 0x597   : > { %v1008_v47 = vpop.xlane.xlu0 %1007 }
 0x598   : > { %2467 = vpow2.f32 %v1011_v46  ;;  %v1010_v48 = vsub.f32 %v2196_v28, %v1008_v47 }
 0x59a   : > { %v1013_v49 = vmul.f32 1.442695, %v1010_v48 }
 0x59c   : > { %2469 = vpow2.f32 %v1013_v49 }
 0x5a2   : > { %v2468_v50 = vpop.eup %2467 }
 0x5a3   : > { %v1015_v51 = vsel %vm794_vm5, %v2468_v50, 0.0 }
 0x5a4   : > { %1016 = vadd.xlane.f32.xlu0 %v1015_v51 }
 0x5a6   : > { %v3162_v52 = vpop.eup %2469 }
 0x5a7   : > { %v1018_v53 = vsel %vm794_vm5, %v3162_v52, 0.0 }
 0x5a8   : > { %1019 = vadd.xlane.f32.xlu1 %v1018_v53 }
 0x5b9   : > { %821 = vrot.lane.b32.xlu1 %v3120_v7, %s2734_s29 }
 0x5ba   : > { %2433 = vrot.lane.b32.xlu0 %v3104_v63, %s2734_s29  ;;  %s2643_s29 = sshll.u32 %s2740_s24, 4  ;;  %s2644_s29 = int_to_ptr.vmem [resolvable:$false] %s2643_s29 }
 0x5bb   : > { %p2646_p0 = scmp.lt.s32.totalorder %s3230_s27, %s2644_s29 }
 0x5bd   : > { %2438 = vrot.lane.b32.xlu1 %v3104_v63, %s2735_s26 }
 0x5be   : > { %2443 = vrot.lane.b32.xlu0 %v3104_v63, %s2736_s1 }
 0x5c1   : > { %1029 = vrot.lane.b32.xlu1 %v3120_v7, %s2735_s26  ;;  %s2645_s26 = scalar_lea.vmem %s2644_s29, 512 }
 0x5c2   : > { %1569 = vrot.lane.b32.xlu0 %v3096_v59, %s2737_s7  ;;  %p2647_p8 = scmp.lt.s32.totalorder %s2645_s26, %s2639_s25 }
 0x5c4   : > { %p2648_p6 = por %p2647_p8, %p2646_p0 }
 0x5c5   : > { %1577 = vrot.lane.b32.xlu1 %v3120_v7, %s2736_s1 }
 0x5c6   : > { %p2649_p10 = pnand %p2648_p6, %p2642_p4 }
 0x5c9   : > { %1571 = vrot.lane.b32.xlu1 %v3100_v61, %s2737_s7 }
 0x5e1   : > { %1374 = vmax.xlane.f32.xlu0 %v1373_v54 }
 0x5ed   : > { %1377 = vmax.xlane.f32.xlu1 %v1376_v55 }
 0x5fe   : > { %1399 = vrot.lane.b32.xlu1 %v3120_v7, %s2738_s22 }
 0x620   : > { %v812_v59 = vpop.xlane.xlu1 %811 }
 0x621   : > { %v809_v56 = vpop.xlane.xlu0 %808 }
 0x622   : > { %2471 = vrcp.f32 %v809_v56  ;;  %v1485_v56 = vld [vmem:[#allocation11 + $0x10] sm:$0xff] }
 0x623   : > { %2473 = vrcp.f32 %v812_v59 }
 0x62c   : > { %v2472_v57 = vpop.eup %2471 }
 0x62d   : > { %v815_v58 = vmul.f32 %v2472_v57, %v2466_v41  ;;  %v2474_v11 = vpop.eup %2473 }
 0x62e   : > { %v816_v16 = vmul.f32 %v2474_v11, %v3156_v40 }
 0x62f   : > { %2185 = vmatprep.mubr.msk.f32.mxu1 %vm794_vm5, %v815_v58 }
 0x631   : > { %v1017_v60 = vpop.xlane.xlu0 %1016 }
 0x632   : > { %2475 = vrcp.f32 %v1017_v60 }
 0x635   : > { %v1020_v61 = vpop.xlane.xlu1 %1019  ;;  %v2434_v62 = vpop.permute.xlu0 %2433 }
 0x636   : > { %v2436_v0 = vunpack.i.h.bf16 %v2434_v62  ;;  %v2435_v1 = vunpack.i.l.bf16 %v2434_v62  ;;  %2477 = vrcp.f32 %v1020_v61 }
 0x638   : > { %v2277_v2 = vpack.c.bf16 %v2436_v0, %v2435_v1 }
 0x639   : > { %v822_v4 = vpop.permute.xlu1 %821  ;;  %v2444_v8 = vpop.permute.xlu0 %2443 }
 0x63a   : > { %v2446_v9 = vunpack.i.h.bf16 %v2444_v8  ;;  %v2445_v10 = vunpack.i.l.bf16 %v2444_v8  ;;  %2278 = vmatprep.subr.bf16.mxu1 %v2277_v2 }
 0x63b   : > { %2280 = vmatpush3.bf16.msra.mxu1 %v2277_v2 }
 0x63c   : > { %v2476_v12 = vpop.eup %2475  ;;  %v2301_v13 = vpack.c.bf16 %v2446_v9, %v2445_v10  ;;  %2183 = vmatprep.subr.mxu1 %v822_v4 }
 0x63d   : > { %v2439_v14 = vpop.permute.xlu1 %2438  ;;  %v1570_v15 = vpop.permute.xlu0 %1569  ;;  %v1023_v19 = vmul.f32 %v2476_v12, %v2468_v50 }
 0x63e   : > { %v2441_v17 = vunpack.i.h.bf16 %v2439_v14  ;;  %v2440_v18 = vunpack.i.l.bf16 %v2439_v14  ;;  %2303 = vmatprep.subr.msk.bf16.mxu0 %vm3112_vm4, %v2301_v13  ;;  %2245 = vmatprep.mubr.msk.f32.mxu0 %vm708_vm3, %v1570_v15 }
 0x63f   : > { %2184 = vmatpush3.msra.mxu1 %v822_v4  ;;  %2306 = vmatpush3.bf16.xpose.msk.msra.mxu0 %vm3112_vm4, %v2301_v13 }
 0x640   : > { %v2287_v20 = vpack.c.bf16 %v2441_v17, %v2440_v18  ;;  %2186 = vmatmul.mubr.msk.f32.vlgmr.msra.gmra.mrb[6].mxu1 %vm794_vm5, %v816_v16  ;;  %v2478_v22 = vpop.eup %2477  ;;  %v1776_v18 = vld [vmem:[#allocation11 + $0x18] sm:$0xff] }
 0x641   : > { %v1030_v21 = vpop.permute.xlu1 %1029  ;;  %2203 = vmatprep.mubr.msk.f32.mxu1 %vm794_vm5, %v1023_v19  ;;  %v1024_v24 = vmul.f32 %v2478_v22, %v3162_v52  ;;  %v2076_v22 = vld [vmem:[%s3286_s9] ss:$0 sm:$0xff] }
 0x642   : > { %2288 = vmatprep.subr.bf16.mxu1 %v2287_v20 }
 0x643   : > { %2290 = vmatpush3.bf16.msra.mxu1 %v2287_v20 }
 0x644   : > { %2201 = vmatprep.subr.mxu1 %v1030_v21 }
 0x645   : > { %v1578_v23 = vpop.permute.xlu1 %1577 }
 0x646   : > { %2243 = vmatprep.subr.msk.mxu0 %vm708_vm3, %v1578_v23 }
 0x647   : > { %2202 = vmatpush3.msra.mxu1 %v1030_v21  ;;  %2244 = vmatpush3.xpose.msk.msra.mxu0 %vm708_vm3, %v1578_v23 }
 0x648   : > { %2204 = vmatmul.mubr.msk.f32.vlgmr.msra.gmra.mrb[8].mxu1 %vm794_vm5, %v1024_v24  ;;  %2206 = vmatprep.subr.mxu1 %v1115_v37  ;;  %v1870_v24 = vstv %s1869_s20 }
 0x649   : > { %v1572_v3 = vpop.permute.xlu1 %1571  ;;  %2207 = vmatpush3.msra.mxu1 %v1115_v37 }
 0x64a   : > { %2246 = vmatmul.mubr.msk.f32.vlgmr.msra.gmra.mrb[8].mxu0 %vm708_vm3, %v1572_v3  ;;  %2211 = vmatprep.subr.mxu1 %v907_v38 }
 0x66e   : > { %v1375_v25 = vpop.xlane.xlu0 %1374 }
 0x66f   : > { %v1379_v26 = vsub.f32 %v3154_v33, %v1375_v25 }
 0x671   : > { %v1381_v29 = vmul.f32 1.442695, %v1379_v26 }
 0x67a   : > { %v1378_v27 = vpop.xlane.xlu1 %1377 }
 0x67b   : > { %v1380_v28 = vsub.f32 %v3152_v32, %v1378_v27 }
 0x67d   : > { %v1383_v30 = vmul.f32 1.442695, %v1380_v28 }
 0x67e   : > { %v1400_v53 = vpop.permute.xlu1 %1399 }
 0x67f   : > { %2479 = vpow2.f32 %v1383_v30 }
 0x680   : > { %2481 = vpow2.f32 %v1381_v29 }
 0x689   : > { %v2480_v31 = vpop.eup %2479 }
 0x68a   : > { %v1388_v34 = vsel %vm794_vm5, %v2480_v31, 0.0  ;;  %v2482_v35 = vpop.eup %2481 }
 0x68b   : > { %1389 = vadd.xlane.f32.xlu0 %v1388_v34  ;;  %v1385_v36 = vsel %vm794_vm5, %v2482_v35, 0.0 }
 0x68f   : > { %1386 = vadd.xlane.f32.xlu0 %v1385_v36 }
 0x6a5   : > { %2448 = vrot.lane.b32.xlu0 %v3104_v63, %s2738_s22 }
 0x713   : > { %v2187_v32 = vpop.f32.mrb[6].mxu1 }
 0x714   : > { %v898_v33 = vpop.f32.mrb[7].mxu1 }
 0x718   : > { %v1390_v39 = vpop.xlane.xlu0 %1389 }
 0x719   : > { %2483 = vrcp.f32 %v1390_v39 }
 0x71b   : > { %v2205_v40 = vpop.f32.mrb[8].mxu1 }
 0x71c   : > { %v1387_v41 = vpop.xlane.xlu0 %1386  ;;  %v1106_v42 = vpop.f32.mrb[9].mxu1 }
 0x71d   : > { %2485 = vrcp.f32 %v1387_v41  ;;  %2208 = vmatprep.mubr.msk.f32.mxu1 %vm708_vm3, %v1106_v42  ;;  %v2247_v43 = vpop.f32.mrb[8].mxu0 }
 0x71e   : > { %2209 = vmatmul.mubr.msk.f32.vlgmr.msra.gmra.mrb[10].mxu1 %vm708_vm3, %v2205_v40  ;;  %v1655_v44 = vpop.f32.mrb[9].mxu0  ;;  %v1667_v45 = vsel %vm794_vm5, %v2247_v43, -inf }
 0x71f   : > { %1668 = vmax.xlane.f32.xlu0 %v1667_v45  ;;  %2213 = vmatprep.mubr.msk.f32.mxu1 %vm708_vm3, %v898_v33  ;;  %v1664_v46 = vsel %vm794_vm5, %v1655_v44, -inf }
 0x720   : > { %v2449_v47 = vpop.permute.xlu0 %2448  ;;  %1665 = vmax.xlane.f32.xlu1 %v1664_v46  ;;  %2212 = vmatpush3.msra.mxu1 %v907_v38 }
 0x721   : > { %v2451_v48 = vunpack.i.h.bf16 %v2449_v47  ;;  %v2450_v49 = vunpack.i.l.bf16 %v2449_v47 }
 0x723   : > { %v2297_v50 = vpack.c.bf16 %v2451_v48, %v2450_v49  ;;  %v2484_v51 = vpop.eup %2483 }
 0x724   : > { %v1394_v55 = vmul.f32 %v2484_v51, %v2480_v31 }
 0x725   : > { %2298 = vmatprep.subr.bf16.mxu1 %v2297_v50 }
 0x726   : > { %2214 = vmatmul.mubr.msk.f32.vlgmr.msra.gmra.mrb[10].mxu1 %vm708_vm3, %v2187_v32 }
 0x727   : > { %v2486_v52 = vpop.eup %2485  ;;  %2300 = vmatpush3.bf16.msra.mxu1 %v2297_v50 }
 0x728   : > { %2229 = vmatprep.subr.mxu1 %v1400_v53  ;;  %v1393_v54 = vmul.f32 %v2486_v52, %v2482_v35 }
 0x72a   : > { %2231 = vmatprep.mubr.msk.f32.mxu1 %vm794_vm5, %v1393_v54 }
 0x72b   : > { %2230 = vmatpush3.msra.mxu1 %v1400_v53 }
 0x72c   : > { %2232 = vmatmul.mubr.msk.f32.vlgmr.msra.gmra.mrb[12].mxu1 %vm794_vm5, %v1394_v55  ;;  %2234 = vmatprep.subr.mxu1 %v1485_v56 }
 0x72d   : > { %2235 = vmatpush3.msra.mxu1 %v1485_v56 }
 0x7ac   : > { %v1669_v57 = vpop.xlane.xlu0 %1668 }
 0x7ad   : > { %v1671_v58 = vsub.f32 %v2247_v43, %v1669_v57  ;;  %v1666_v59 = vpop.xlane.xlu1 %1665 }
 0x7ae   : > { %v1670_v60 = vsub.f32 %v1655_v44, %v1666_v59 }
 0x7af   : > { %v1674_v61 = vmul.f32 1.442695, %v1671_v58 }
 0x7b0   : > { %v1672_v62 = vmul.f32 1.442695, %v1670_v60 }
 0x7b1   : > { %2487 = vpow2.f32 %v1674_v61 }
 0x7b2   : > { %2489 = vpow2.f32 %v1672_v62 }
 0x7bb   : > { %v2488_v0 = vpop.eup %2487 }
 0x7bc   : > { %v2490_v1 = vpop.eup %2489  ;;  %v1679_v2 = vsel %vm794_vm5, %v2488_v0, 0.0 }
 0x7bd   : > { %1680 = vadd.xlane.f32.xlu1 %v1679_v2  ;;  %v1676_v4 = vsel %vm794_vm5, %v2490_v1, 0.0 }
 0x7be   : > { %1677 = vadd.xlane.f32.xlu0 %v1676_v4 }
 0x7ce   : > { %1690 = vrot.lane.b32.xlu1 %v3120_v7, %s2739_s10 }
 0x7d4   : > { %2453 = vrot.lane.b32.xlu0 %v3104_v63, %s2739_s10 }
 0x7ff   : > { %v2233_v8 = vpop.f32.mrb[12].mxu1 }
 0x800   : > { %v1476_v9 = vpop.f32.mrb[13].mxu1 }
 0x801   : > { %2236 = vmatprep.mubr.msk.f32.mxu1 %vm708_vm3, %v1476_v9 }
 0x802   : > { %2237 = vmatmul.mubr.msk.f32.vlgmr.msra.gmra.mrb[10].mxu1 %vm708_vm3, %v2233_v8 }
 0x84a   : > { %v1681_v10 = vpop.xlane.xlu1 %1680 }
 0x84b   : > { %2491 = vrcp.f32 %v1681_v10  ;;  %v1678_v11 = vpop.xlane.xlu0 %1677 }
 0x84c   : > { %2493 = vrcp.f32 %v1678_v11 }
 0x84e   : > { %v1691_v17 = vpop.permute.xlu1 %1690 }
 0x84f   : > { %v2454_v12 = vpop.permute.xlu0 %2453 }
 0x850   : > { %v2456_v13 = vunpack.i.h.bf16 %v2454_v12  ;;  %v2455_v14 = vunpack.i.l.bf16 %v2454_v12 }
 0x852   : > { %v2307_v15 = vpack.c.bf16 %v2456_v13, %v2455_v14 }
 0x854   : > { %2308 = vmatprep.subr.bf16.mxu1 %v2307_v15 }
 0x855   : > { %v2492_v16 = vpop.eup %2491  ;;  %2310 = vmatpush3.bf16.msra.mxu1 %v2307_v15 }
 0x856   : > { %v2494_v7 = vpop.eup %2493  ;;  %2252 = vmatprep.subr.mxu1 %v1691_v17  ;;  %v1685_v19 = vmul.f32 %v2492_v16, %v2488_v0 }
 0x857   : > { %v1684_v63 = vmul.f32 %v2494_v7, %v2490_v1 }
 0x859   : > { %2253 = vmatpush3.msra.mxu1 %v1691_v17  ;;  %2254 = vmatprep.mubr.msk.f32.mxu1 %vm794_vm5, %v1684_v63 }
 0x85a   : > { %2255 = vmatmul.mubr.msk.f32.vlgmr.msra.gmra.mrb[14].mxu1 %vm794_vm5, %v1685_v19  ;;  %2257 = vmatprep.subr.mxu1 %v1776_v18 }
 0x85b   : > { %2258 = vmatpush3.msra.mxu1 %v1776_v18 }
 0x92d   : > { %v2256_v20 = vpop.f32.mrb[14].mxu1 }
 0x92e   : > { %v1767_v21 = vpop.f32.mrb[15].mxu1 }
 0x92f   : > { %2259 = vmatprep.mubr.msk.f32.mxu1 %vm708_vm3, %v1767_v21 }
 0x930   : > { %2260 = vmatmul.mubr.msk.f32.vlgmr.msra.gmra.mrb[10].mxu1 %vm708_vm3, %v2256_v20 }
 0xa03   : > { %v2261_v23 = vpop.f32.mrb[10].mxu1 }
 0xa04   : > { %v1868_v3 = vadd.f32 %v2261_v23, %v2076_v22  ;;  %v1849_v25 = vpop.f32.mrb[11].mxu1 }
 0xa05   : > { %v1867_v26 = vadd.f32 %v2076_v22, %v1849_v25 }
 0xa06   : > { %v1872_v27 = vmul.f32 %v1870_v24, %v1868_v3 }
 0xa07   : > { %v1871_v28 = vmul.f32 %v1870_v24, %v1867_v26 }
 0xa08   : > { %v1874_v29 = vadd.f32 %v1872_v27, %v3068_v6 }
 0xa09   : > { %v1873_v30 = vadd.f32 %v1871_v28, %v3066_v5 }
 0xa0a   : > { %1876 = vst.msk [vmem:[%s458_s28 + $0x8] sm:$0xff] %vm545_vm1, %v1874_v29 }
 0xa0b   : > { %1875 = vst.msk [vmem:[%s458_s28] sm:$0xff] %vm545_vm1, %v1873_v30 }
 0xa0c   : > { %2652 = shalt.err (!%p2649_p10)
}
 0xa0d   : > { %s2653_s1 = scalar_lea.hbm %s3228_s23, 256  ;;  %s2657_s10 = scalar_lea.hbm %s3325_s30, 512 }
 0xa0e   : > { %p2654_p13 = scmp.ne.s32.totalorder %s3228_s23, %s2653_s1  ;;  %p2658_p9 = scmp.lt.u32.totalorder %s3228_s23, %s3325_s30 }
 0xa0f   : > { %p2659_p3 = scmp.lt.u32.totalorder %s2657_s10, %s2653_s1  ;;  %p2661_p12 = scmp.lt.u32.totalorder %s2653_s1, %s3228_s23 }
 0xa10   : > { %p2655_p5 = pnand %p2654_p13, %p3326_p1 }
 0xa11   : > { %p2660_p7 = por %p2659_p3, %p2658_p9 }
 0xa12   : > { %p2656_p11 = pneg %p2655_p5 }
 0xa13   : > { %p2662_p2 = por %p2661_p12, %p2660_p7 }
 0xa15   : > { %p2663_p4 = pnand %p2662_p2, %p2656_p11 }
 0xa17   : > { %2666 = shalt.err (!%p2663_p4)
}
 0xa18   : > { %s2741_s11 = smov 128   ;;  %s2742_s13 = smov 8  }
 0xa19   : > { %2333 = dma.vmem_to_hbm [thread:$0]  (%p3326_p1), %s3230_s27, 256, %s3228_s23, %s1878_s0, %s2741_s11, %s2741_s11, %s2742_s13  }
 0xa1a PF: > { %s3327_s28 = sld [smem:[#allocation18_spill]]  ;;  %s3328_s15 = sld [smem:[#allocation19_spill]] }
 0xa1b   : > { %p3330_p8 = scmp.ge.s32.totalorder %s2717_s18, 2 }
 0xa20   : > { %s1906_s3 = sand.u32 1, %s3327_s28   ;;  %p3329_p0 = scmp.ne.s32.totalorder %s3328_s15, 0 }
 0xa21   : > { %s1907_s25 = scalar_lea.sflag [#allocation5], %s1906_s3 }
 0xa22   : > { %p2353_p6 = pnand %p3330_p8, %p3329_p0 }
 0xa24   : > { %2700 = dma.done.wait (!%p2353_p6), %s1907_s25, 256  }
 0xa25   : > { %2702 = vsyncadd (!%p2353_p6), %s1907_s25, 4294967040  ;;  %p28_p10 = scmp.ge.s32.totalorder %s2941_s19, 4   ;;  %s3331_s15 = smov %s2709_s16 }
 0xa26   : > { %s3332_s16 = smov %s2713_s17  ;;  %s3333_s17 = smov %s2951_s21 }
 0xa27   : > { %s3334_s18 = smov %s2941_s19  ;;  %30 = sbr.rel (!%p28_p10) target bundleno = 15 (0xf), region = 130 }
 0xa2e   :  { %1912 = vsyncpa [#allocation4], 1 }
 0xa2f   :  { %1914 = vsyncpa [#allocation4 + $0x1], 1 }
 0xa30   :  { %1915 = vsyncpa [#allocation7], 1 }
 0xa31   :  { %1917 = vsyncpa [#allocation7 + $0x1], 1 }
 0xa32   :  { %1918 = vsyncpa [#allocation10], 1 }
 0xa33   :  { %1919 = vsyncpa [#allocation5], 1 }
 0xa34   :  { %1921 = vsyncpa [#allocation5 + $0x1], 1 }

</bundles_post_ra>
